<compile_context>
chip_gen: v6e
topology: v6e:2x2x1
jax: 0.10.0
libtpu: 0.0.40
codegen_flags: <defaults>
</compile_context>

<pallas_src>
import math
from functools import partial

import jax
import jax.numpy as jnp
from jax.experimental import pallas as pl
from jax.experimental.pallas import tpu as pltpu  # noqa: F401  (TPU backend assumed)


# ------------------------------ in-kernel helpers ------------------------------

def _layer_norm(x, w, b, eps=1e-5):
    # PyTorch nn.LayerNorm: biased variance, eps inside the sqrt.
    mean = jnp.mean(x, axis=-1, keepdims=True)
    var = jnp.mean(jnp.square(x - mean), axis=-1, keepdims=True)
    return (x - mean) * jax.lax.rsqrt(var + eps) * w + b


def _gelu_exact(x):
    # F.gelu default (exact, erf-based) variant.
    return 0.5 * x * (1.0 + jax.lax.erf(x * (1.0 / math.sqrt(2.0))))


# ------------------------------ fused Pallas kernel ------------------------------

def fused_forward_kernel(emb_ref, pe_ref,
                         wqkv_ref, bqkv_ref, wo_ref, bo_ref,
                         w1_ref, b1_ref, w2_ref, b2_ref,
                         ln1w_ref, ln1b_ref, ln2w_ref, ln2b_ref,
                         outw_ref, outb_ref,
                         out_ref, *, B, S, d_model, nhead, num_layers):
    D = d_model
    H = nhead
    hd = D // H
    BS = B * S
    scale = 1.0 / math.sqrt(hd)

    # x = embedding(src) * sqrt(d_model) + pe[:S]   (activations kept as (B*S, D))
    x = emb_ref[...] * math.sqrt(D) + pe_ref[...]

    # Causal mask built in-kernel: allowed where key_pos <= query_pos.
    row = jax.lax.broadcasted_iota(jnp.int32, (1, S, S), 1)
    col = jax.lax.broadcasted_iota(jnp.int32, (1, S, S), 2)
    causal = col <= row                                         # (1, S, S), broadcast over B

    for l in range(num_layers):                                 # static unroll over layers
        wqkv = wqkv_ref[l]                                      # (D, 3D)  pre-transposed
        wo = wo_ref[l]                                          # (D, D)   pre-transposed

        # ---- multi-head self-attention (nn.MultiheadAttention, batch_first) ----
        qkv = jnp.dot(x, wqkv, preferred_element_type=jnp.float32) + bqkv_ref[l]  # (BS, 3D)
        q = qkv[:, 0:D].reshape(B, S, D)
        k = qkv[:, D:2 * D].reshape(B, S, D)
        v = qkv[:, 2 * D:3 * D].reshape(B, S, D)

        # concat(heads) @ Wo^T  ==  sum_h head_h @ Wo^T[h*hd:(h+1)*hd, :]
        attn = jnp.zeros((BS, D), jnp.float32)
        for h in range(H):                                      # static unroll over heads
            sl = slice(h * hd, (h + 1) * hd)
            qh, kh, vh = q[..., sl], k[..., sl], v[..., sl]     # (B, S, hd)
            s = jnp.einsum('bqd,bkd->bqk', qh, kh,
                           preferred_element_type=jnp.float32) * scale   # (B, S, S)
            s = jnp.where(causal, s, -1e30)
            m = jnp.max(s, axis=-1, keepdims=True)
            e = jnp.exp(s - m)
            p = e / jnp.sum(e, axis=-1, keepdims=True)
            oh = jnp.einsum('bqk,bkd->bqd', p, vh,
                            preferred_element_type=jnp.float32).reshape(BS, hd)
            attn = attn + jnp.dot(oh, wo[sl, :], preferred_element_type=jnp.float32)
        attn = attn + bo_ref[l]

        # ---- residual + norm1 ----
        x = _layer_norm(x + attn, ln1w_ref[l], ln1b_ref[l])

        # ---- feed-forward (linear1 -> gelu -> linear2) ----
        h1 = jnp.dot(x, w1_ref[l], preferred_element_type=jnp.float32) + b1_ref[l]
        h1 = _gelu_exact(h1)
        ffn = jnp.dot(h1, w2_ref[l], preferred_element_type=jnp.float32) + b2_ref[l]

        # ---- residual + norm2 ----
        x = _layer_norm(x + ffn, ln2w_ref[l], ln2b_ref[l])

    # ---- output projection (vocab padded to lane-dense width; sliced outside) ----
    out_ref[...] = jnp.dot(x, outw_ref[...], preferred_element_type=jnp.float32) + outb_ref[...]


# ------------------------------ wrapper ------------------------------

def diacritics_restorer_forward(src, kp, *, d_model, nhead):
    """src: (B, S) int32 token ids.  Returns logits (B, S, vocab_size) float32."""
    B, S = src.shape
    D = d_model
    BS = B * S
    L = kp["wqkv"].shape[0]
    Vpad = kp["out_w"].shape[1]
    V = kp["vocab_size"]

    # glue (layout plumbing, not compute hoisting): embedding gather + PE tiling
    emb = jnp.take(kp["embedding"], src, axis=0).reshape(BS, D)      # (BS, D)
    pe = jnp.tile(kp["pe"][:S], (B, 1))                              # (BS, D)

    # Whole forward pass in ONE pallas_call; everything fits in VMEM at these shapes.
    # (On v7x one could add a parallel batch grid axis to use both TensorCores.)
    out = pl.pallas_call(
        partial(fused_forward_kernel, B=B, S=S, d_model=D, nhead=nhead, num_layers=L),
        out_shape=jax.ShapeDtypeStruct((BS, Vpad), jnp.float32),
    )(emb, pe,
      kp["wqkv"], kp["bqkv"], kp["wo"], kp["bo"],
      kp["w1"], kp["b1"], kp["w2"], kp["b2"],
      kp["ln1w"], kp["ln1b"], kp["ln2w"], kp["ln2b"],
      kp["out_w"], kp["out_b"])

    return out.reshape(B, S, Vpad)[:, :, :V]


# ------------------------------ parameter init / packing ------------------------------

def _xavier_uniform(key, shape):
    fan_out, fan_in = shape[0], shape[1]
    limit = math.sqrt(6.0 / (fan_in + fan_out))
    return jax.random.uniform(key, shape, jnp.float32, -limit, limit)


def make_positional_encoding(max_len, d_model):
    position = jnp.arange(max_len, dtype=jnp.float32)[:, None]
    div_term = jnp.exp(jnp.arange(0, d_model, 2, dtype=jnp.float32)
                       * (-math.log(10000.0) / d_model))
    pe = jnp.zeros((max_len, d_model), jnp.float32)
    pe = pe.at[:, 0::2].set(jnp.sin(position * div_term))
    pe = pe.at[:, 1::2].set(jnp.cos(position * div_term))
    return pe


def init_params(key, vocab_size, d_model, nhead, num_layers, dim_ff, max_len):
    # PyTorch (out_features, in_features) convention; QKV rows ordered [q; k; v].
    keys = jax.random.split(key, 2 + 5 * num_layers)
    ki = iter(keys)
    params = {
        "embedding": _xavier_uniform(next(ki), (vocab_size, d_model)),
        "pe": make_positional_encoding(max_len, d_model),
        "out_w": _xavier_uniform(next(ki), (vocab_size, d_model)),
        "out_b": jnp.zeros((1, vocab_size), jnp.float32),
        "layers": [],
    }
    for _ in range(num_layers):
        params["layers"].append({
            "wqkv": _xavier_uniform(next(ki), (3 * d_model, d_model)),
            "bqkv": jnp.zeros((1, 3 * d_model), jnp.float32),
            "wo":   _xavier_uniform(next(ki), (d_model, d_model)),
            "bo":   jnp.zeros((1, d_model), jnp.float32),
            "w1":   _xavier_uniform(next(ki), (dim_ff, d_model)),
            "b1":   jnp.zeros((1, dim_ff), jnp.float32),
            "w2":   _xavier_uniform(next(ki), (d_model, dim_ff)),
            "b2":   jnp.zeros((1, d_model), jnp.float32),
            "ln1w": jnp.ones((1, d_model), jnp.float32),
            "ln1b": jnp.zeros((1, d_model), jnp.float32),
            "ln2w": jnp.ones((1, d_model), jnp.float32),
            "ln2b": jnp.zeros((1, d_model), jnp.float32),
        })
    return params


def pack_params(params):
    """Stack per-layer weights on a leading L axis, pre-transpose linears to (in, out),
    and pad the output projection to a lane-dense (multiple-of-128) vocab width."""
    def stack_t(name):
        return jnp.stack([lp[name].T for lp in params["layers"]])

    def stack(name):
        return jnp.stack([lp[name] for lp in params["layers"]])

    V, D = params["out_w"].shape
    Vpad = ((V + 127) // 128) * 128
    out_w = jnp.zeros((D, Vpad), jnp.float32).at[:, :V].set(params["out_w"].T)
    out_b = jnp.zeros((1, Vpad), jnp.float32).at[:, :V].set(params["out_b"])

    return {
        "embedding": params["embedding"],
        "pe": params["pe"],
        "wqkv": stack_t("wqkv"), "bqkv": stack("bqkv"),
        "wo": stack_t("wo"),     "bo": stack("bo"),
        "w1": stack_t("w1"),     "b1": stack("b1"),
        "w2": stack_t("w2"),     "b2": stack("b2"),
        "ln1w": stack("ln1w"),   "ln1b": stack("ln1b"),
        "ln2w": stack("ln2w"),   "ln2b": stack("ln2b"),
        "out_w": out_w, "out_b": out_b,
        "vocab_size": V,
    }


# ------------------------------ main ------------------------------

if __name__ == "__main__":
    # Small shapes consistent with the module (scaled-down transformer encoder).
    vocab_size = 48
    d_model = 32
    nhead = 4
    num_layers = 2
    dim_ff = 64
    max_len = 64
    B, S = 2, 8

    root = jax.random.PRNGKey(0)
    k_params, k_src = jax.random.split(root)
    params = init_params(k_params, vocab_size, d_model, nhead, num_layers, dim_ff, max_len)
    kparams = pack_params(params)
    src = jax.random.randint(k_src, (B, S), 0, vocab_size, dtype=jnp.int32)

    logits = diacritics_restorer_forward(src, kparams, d_model=d_model, nhead=nhead)
    jax.block_until_ready(logits)
    assert logits.shape == (B, S, vocab_size) and logits.dtype == jnp.float32
    assert bool(jnp.all(jnp.isfinite(logits)))
    print("KERNEL_OK")
</pallas_src>

<mosaic_0001>
module attributes {stable_mosaic.version = 11 : i64} {
  func.func @fused_forward_kernel(%arg0: memref<16x32xf32, #tpu.memory_space<vmem>>, %arg1: memref<16x32xf32, #tpu.memory_space<vmem>>, %arg2: memref<2x32x96xf32, #tpu.memory_space<vmem>>, %arg3: memref<2x1x96xf32, #tpu.memory_space<vmem>>, %arg4: memref<2x32x32xf32, #tpu.memory_space<vmem>>, %arg5: memref<2x1x32xf32, #tpu.memory_space<vmem>>, %arg6: memref<2x32x64xf32, #tpu.memory_space<vmem>>, %arg7: memref<2x1x64xf32, #tpu.memory_space<vmem>>, %arg8: memref<2x64x32xf32, #tpu.memory_space<vmem>>, %arg9: memref<2x1x32xf32, #tpu.memory_space<vmem>>, %arg10: memref<2x1x32xf32, #tpu.memory_space<vmem>>, %arg11: memref<2x1x32xf32, #tpu.memory_space<vmem>>, %arg12: memref<2x1x32xf32, #tpu.memory_space<vmem>>, %arg13: memref<2x1x32xf32, #tpu.memory_space<vmem>>, %arg14: memref<32x128xf32, #tpu.memory_space<vmem>>, %arg15: memref<1x128xf32, #tpu.memory_space<vmem>>, %arg16: memref<16x128xf32, #tpu.memory_space<vmem>>) attributes {dimension_semantics = [], scalar_prefetch = 0 : i64, scratch_operands = 0 : i64, tpu.core_type = #tpu.core_type<tc>} {
    %c0 = arith.constant 0 : index
    %c0_0 = arith.constant 0 : index
    %0 = vector.load %arg0[%c0, %c0_0] : memref<16x32xf32, #tpu.memory_space<vmem>>, vector<16x32xf32>
    %cst = arith.constant 5.65685415 : f32
    %1 = vector.broadcast %cst : f32 to vector<16x32xf32>
    %2 = arith.mulf %0, %1 : vector<16x32xf32>
    %c0_1 = arith.constant 0 : index
    %c0_2 = arith.constant 0 : index
    %3 = vector.load %arg1[%c0_1, %c0_2] : memref<16x32xf32, #tpu.memory_space<vmem>>, vector<16x32xf32>
    %4 = arith.addf %2, %3 : vector<16x32xf32>
    %5 = tpu.iota {dimensions = array<i32: 1>} : vector<1x8x8xi32>
    %6 = tpu.iota {dimensions = array<i32: 2>} : vector<1x8x8xi32>
    %7 = arith.cmpi sle, %6, %5 : vector<1x8x8xi32>
    %c0_3 = arith.constant 0 : index
    %c0_4 = arith.constant 0 : index
    %c0_5 = arith.constant 0 : index
    %8 = vector.load %arg2[%c0_3, %c0_4, %c0_5] : memref<2x32x96xf32, #tpu.memory_space<vmem>>, vector<1x32x96xf32>
    %9 = vector.shape_cast %8 : vector<1x32x96xf32> to vector<32x96xf32>
    %c0_6 = arith.constant 0 : index
    %c0_7 = arith.constant 0 : index
    %c0_8 = arith.constant 0 : index
    %10 = vector.load %arg4[%c0_6, %c0_7, %c0_8] : memref<2x32x32xf32, #tpu.memory_space<vmem>>, vector<1x32x32xf32>
    %11 = vector.shape_cast %10 : vector<1x32x32xf32> to vector<32x32xf32>
    %cst_9 = arith.constant dense<0.000000e+00> : vector<16x96xf32>
    %12 = tpu.matmul %4, %9, %cst_9 {dimension_numbers = #tpu.dot_dimension_numbers<[1], [0], [0], [1], [0, 0, 1, 1], [], []>} : vector<16x32xf32>, vector<32x96xf32>, vector<16x96xf32> -> vector<16x96xf32>
    %c0_10 = arith.constant 0 : index
    %c0_11 = arith.constant 0 : index
    %c0_12 = arith.constant 0 : index
    %13 = vector.load %arg3[%c0_10, %c0_11, %c0_12] : memref<2x1x96xf32, #tpu.memory_space<vmem>>, vector<1x1x96xf32>
    %14 = vector.shape_cast %13 : vector<1x1x96xf32> to vector<1x96xf32>
    %15 = vector.broadcast %14 : vector<1x96xf32> to vector<16x96xf32>
    %16 = arith.addf %12, %15 : vector<16x96xf32>
    %17 = vector.extract_strided_slice %16 {offsets = [0, 0], sizes = [16, 32], strides = [1, 1]} : vector<16x96xf32> to vector<16x32xf32>
    %18 = vector.shape_cast %17 : vector<16x32xf32> to vector<2x8x32xf32>
    %19 = vector.extract_strided_slice %16 {offsets = [0, 32], sizes = [16, 32], strides = [1, 1]} : vector<16x96xf32> to vector<16x32xf32>
    %20 = vector.shape_cast %19 : vector<16x32xf32> to vector<2x8x32xf32>
    %21 = vector.extract_strided_slice %16 {offsets = [0, 64], sizes = [16, 32], strides = [1, 1]} : vector<16x96xf32> to vector<16x32xf32>
    %22 = vector.shape_cast %21 : vector<16x32xf32> to vector<2x8x32xf32>
    %cst_13 = arith.constant 0.000000e+00 : f32
    %23 = vector.broadcast %cst_13 : f32 to vector<16x32xf32>
    %24 = vector.extract_strided_slice %18 {offsets = [0, 0, 0], sizes = [2, 8, 8], strides = [1, 1, 1]} : vector<2x8x32xf32> to vector<2x8x8xf32>
    %25 = vector.extract_strided_slice %20 {offsets = [0, 0, 0], sizes = [2, 8, 8], strides = [1, 1, 1]} : vector<2x8x32xf32> to vector<2x8x8xf32>
    %26 = vector.extract_strided_slice %22 {offsets = [0, 0, 0], sizes = [2, 8, 8], strides = [1, 1, 1]} : vector<2x8x32xf32> to vector<2x8x8xf32>
    "tpu.trace_start"() <{level = 10 : i32, message = "bqd,bkd->bqk"}> : () -> ()
    %cst_14 = arith.constant dense<0.000000e+00> : vector<2x8x8xf32>
    %27 = tpu.matmul %24, %25, %cst_14 {dimension_numbers = #tpu.dot_dimension_numbers<[2], [2], [1], [1], [0, 0, 0, 1, 1, 1], [0], [0]>} : vector<2x8x8xf32>, vector<2x8x8xf32>, vector<2x8x8xf32> -> vector<2x8x8xf32>
    "tpu.trace_stop"() : () -> ()
    %cst_15 = arith.constant 0.353553385 : f32
    %28 = vector.broadcast %cst_15 : f32 to vector<2x8x8xf32>
    %29 = arith.mulf %27, %28 : vector<2x8x8xf32>
    %cst_16 = arith.constant -1.000000e+30 : f32
    %30 = vector.shape_cast %7 : vector<1x8x8xi1> to vector<1x8x8xi1>
    %31 = vector.broadcast %30 : vector<1x8x8xi1> to vector<2x8x8xi1>
    %32 = vector.broadcast %cst_16 : f32 to vector<2x8x8xf32>
    %33 = arith.select %31, %29, %32 : vector<2x8x8xi1>, vector<2x8x8xf32>
    %cst_17 = arith.constant dense<0xFF800000> : vector<2x8xf32>
    %34 = vector.multi_reduction <maximumf>, %33, %cst_17 [2] : vector<2x8x8xf32> to vector<2x8xf32>
    %35 = vector.shape_cast %34 : vector<2x8xf32> to vector<2x8x1xf32>
    %36 = vector.broadcast %35 : vector<2x8x1xf32> to vector<2x8x8xf32>
    %37 = arith.subf %33, %36 : vector<2x8x8xf32>
    %38 = math.exp %37 : vector<2x8x8xf32>
    %cst_18 = arith.constant dense<0.000000e+00> : vector<2x8xf32>
    %39 = vector.multi_reduction <add>, %38, %cst_18 [2] : vector<2x8x8xf32> to vector<2x8xf32>
    %40 = vector.shape_cast %39 : vector<2x8xf32> to vector<2x8x1xf32>
    %41 = vector.broadcast %40 : vector<2x8x1xf32> to vector<2x8x8xf32>
    %42 = arith.divf %38, %41 : vector<2x8x8xf32>
    "tpu.trace_start"() <{level = 10 : i32, message = "bqk,bkd->bqd"}> : () -> ()
    %cst_19 = arith.constant dense<0.000000e+00> : vector<2x8x8xf32>
    %43 = tpu.matmul %42, %26, %cst_19 {dimension_numbers = #tpu.dot_dimension_numbers<[2], [1], [1], [2], [0, 0, 0, 1, 1, 2], [0], [0]>} : vector<2x8x8xf32>, vector<2x8x8xf32>, vector<2x8x8xf32> -> vector<2x8x8xf32>
    "tpu.trace_stop"() : () -> ()
    %44 = vector.shape_cast %43 : vector<2x8x8xf32> to vector<16x8xf32>
    %45 = vector.extract_strided_slice %11 {offsets = [0, 0], sizes = [8, 32], strides = [1, 1]} : vector<32x32xf32> to vector<8x32xf32>
    %cst_20 = arith.constant dense<0.000000e+00> : vector<16x32xf32>
    %46 = tpu.matmul %44, %45, %cst_20 {dimension_numbers = #tpu.dot_dimension_numbers<[1], [0], [0], [1], [0, 0, 1, 1], [], []>} : vector<16x8xf32>, vector<8x32xf32>, vector<16x32xf32> -> vector<16x32xf32>
    %47 = arith.addf %23, %46 : vector<16x32xf32>
    %48 = vector.extract_strided_slice %18 {offsets = [0, 0, 8], sizes = [2, 8, 8], strides = [1, 1, 1]} : vector<2x8x32xf32> to vector<2x8x8xf32>
    %49 = vector.extract_strided_slice %20 {offsets = [0, 0, 8], sizes = [2, 8, 8], strides = [1, 1, 1]} : vector<2x8x32xf32> to vector<2x8x8xf32>
    %50 = vector.extract_strided_slice %22 {offsets = [0, 0, 8], sizes = [2, 8, 8], strides = [1, 1, 1]} : vector<2x8x32xf32> to vector<2x8x8xf32>
    "tpu.trace_start"() <{level = 10 : i32, message = "bqd,bkd->bqk"}> : () -> ()
    %cst_21 = arith.constant dense<0.000000e+00> : vector<2x8x8xf32>
    %51 = tpu.matmul %48, %49, %cst_21 {dimension_numbers = #tpu.dot_dimension_numbers<[2], [2], [1], [1], [0, 0, 0, 1, 1, 1], [0], [0]>} : vector<2x8x8xf32>, vector<2x8x8xf32>, vector<2x8x8xf32> -> vector<2x8x8xf32>
    "tpu.trace_stop"() : () -> ()
    %cst_22 = arith.constant 0.353553385 : f32
    %52 = vector.broadcast %cst_22 : f32 to vector<2x8x8xf32>
    %53 = arith.mulf %51, %52 : vector<2x8x8xf32>
    %cst_23 = arith.constant -1.000000e+30 : f32
    %54 = vector.shape_cast %7 : vector<1x8x8xi1> to vector<1x8x8xi1>
    %55 = vector.broadcast %54 : vector<1x8x8xi1> to vector<2x8x8xi1>
    %56 = vector.broadcast %cst_23 : f32 to vector<2x8x8xf32>
    %57 = arith.select %55, %53, %56 : vector<2x8x8xi1>, vector<2x8x8xf32>
    %cst_24 = arith.constant dense<0xFF800000> : vector<2x8xf32>
    %58 = vector.multi_reduction <maximumf>, %57, %cst_24 [2] : vector<2x8x8xf32> to vector<2x8xf32>
    %59 = vector.shape_cast %58 : vector<2x8xf32> to vector<2x8x1xf32>
    %60 = vector.broadcast %59 : vector<2x8x1xf32> to vector<2x8x8xf32>
    %61 = arith.subf %57, %60 : vector<2x8x8xf32>
    %62 = math.exp %61 : vector<2x8x8xf32>
    %cst_25 = arith.constant dense<0.000000e+00> : vector<2x8xf32>
    %63 = vector.multi_reduction <add>, %62, %cst_25 [2] : vector<2x8x8xf32> to vector<2x8xf32>
    %64 = vector.shape_cast %63 : vector<2x8xf32> to vector<2x8x1xf32>
    %65 = vector.broadcast %64 : vector<2x8x1xf32> to vector<2x8x8xf32>
    %66 = arith.divf %62, %65 : vector<2x8x8xf32>
    "tpu.trace_start"() <{level = 10 : i32, message = "bqk,bkd->bqd"}> : () -> ()
    %cst_26 = arith.constant dense<0.000000e+00> : vector<2x8x8xf32>
    %67 = tpu.matmul %66, %50, %cst_26 {dimension_numbers = #tpu.dot_dimension_numbers<[2], [1], [1], [2], [0, 0, 0, 1, 1, 2], [0], [0]>} : vector<2x8x8xf32>, vector<2x8x8xf32>, vector<2x8x8xf32> -> vector<2x8x8xf32>
    "tpu.trace_stop"() : () -> ()
    %68 = vector.shape_cast %67 : vector<2x8x8xf32> to vector<16x8xf32>
    %69 = vector.extract_strided_slice %11 {offsets = [8, 0], sizes = [8, 32], strides = [1, 1]} : vector<32x32xf32> to vector<8x32xf32>
    %cst_27 = arith.constant dense<0.000000e+00> : vector<16x32xf32>
    %70 = tpu.matmul %68, %69, %cst_27 {dimension_numbers = #tpu.dot_dimension_numbers<[1], [0], [0], [1], [0, 0, 1, 1], [], []>} : vector<16x8xf32>, vector<8x32xf32>, vector<16x32xf32> -> vector<16x32xf32>
    %71 = arith.addf %47, %70 : vector<16x32xf32>
    %72 = vector.extract_strided_slice %18 {offsets = [0, 0, 16], sizes = [2, 8, 8], strides = [1, 1, 1]} : vector<2x8x32xf32> to vector<2x8x8xf32>
    %73 = vector.extract_strided_slice %20 {offsets = [0, 0, 16], sizes = [2, 8, 8], strides = [1, 1, 1]} : vector<2x8x32xf32> to vector<2x8x8xf32>
    %74 = vector.extract_strided_slice %22 {offsets = [0, 0, 16], sizes = [2, 8, 8], strides = [1, 1, 1]} : vector<2x8x32xf32> to vector<2x8x8xf32>
    "tpu.trace_start"() <{level = 10 : i32, message = "bqd,bkd->bqk"}> : () -> ()
    %cst_28 = arith.constant dense<0.000000e+00> : vector<2x8x8xf32>
    %75 = tpu.matmul %72, %73, %cst_28 {dimension_numbers = #tpu.dot_dimension_numbers<[2], [2], [1], [1], [0, 0, 0, 1, 1, 1], [0], [0]>} : vector<2x8x8xf32>, vector<2x8x8xf32>, vector<2x8x8xf32> -> vector<2x8x8xf32>
    "tpu.trace_stop"() : () -> ()
    %cst_29 = arith.constant 0.353553385 : f32
    %76 = vector.broadcast %cst_29 : f32 to vector<2x8x8xf32>
    %77 = arith.mulf %75, %76 : vector<2x8x8xf32>
    %cst_30 = arith.constant -1.000000e+30 : f32
    %78 = vector.shape_cast %7 : vector<1x8x8xi1> to vector<1x8x8xi1>
    %79 = vector.broadcast %78 : vector<1x8x8xi1> to vector<2x8x8xi1>
    %80 = vector.broadcast %cst_30 : f32 to vector<2x8x8xf32>
    %81 = arith.select %79, %77, %80 : vector<2x8x8xi1>, vector<2x8x8xf32>
    %cst_31 = arith.constant dense<0xFF800000> : vector<2x8xf32>
    %82 = vector.multi_reduction <maximumf>, %81, %cst_31 [2] : vector<2x8x8xf32> to vector<2x8xf32>
    %83 = vector.shape_cast %82 : vector<2x8xf32> to vector<2x8x1xf32>
    %84 = vector.broadcast %83 : vector<2x8x1xf32> to vector<2x8x8xf32>
    %85 = arith.subf %81, %84 : vector<2x8x8xf32>
    %86 = math.exp %85 : vector<2x8x8xf32>
    %cst_32 = arith.constant dense<0.000000e+00> : vector<2x8xf32>
    %87 = vector.multi_reduction <add>, %86, %cst_32 [2] : vector<2x8x8xf32> to vector<2x8xf32>
    %88 = vector.shape_cast %87 : vector<2x8xf32> to vector<2x8x1xf32>
    %89 = vector.broadcast %88 : vector<2x8x1xf32> to vector<2x8x8xf32>
    %90 = arith.divf %86, %89 : vector<2x8x8xf32>
    "tpu.trace_start"() <{level = 10 : i32, message = "bqk,bkd->bqd"}> : () -> ()
    %cst_33 = arith.constant dense<0.000000e+00> : vector<2x8x8xf32>
    %91 = tpu.matmul %90, %74, %cst_33 {dimension_numbers = #tpu.dot_dimension_numbers<[2], [1], [1], [2], [0, 0, 0, 1, 1, 2], [0], [0]>} : vector<2x8x8xf32>, vector<2x8x8xf32>, vector<2x8x8xf32> -> vector<2x8x8xf32>
    "tpu.trace_stop"() : () -> ()
    %92 = vector.shape_cast %91 : vector<2x8x8xf32> to vector<16x8xf32>
    %93 = vector.extract_strided_slice %11 {offsets = [16, 0], sizes = [8, 32], strides = [1, 1]} : vector<32x32xf32> to vector<8x32xf32>
    %cst_34 = arith.constant dense<0.000000e+00> : vector<16x32xf32>
    %94 = tpu.matmul %92, %93, %cst_34 {dimension_numbers = #tpu.dot_dimension_numbers<[1], [0], [0], [1], [0, 0, 1, 1], [], []>} : vector<16x8xf32>, vector<8x32xf32>, vector<16x32xf32> -> vector<16x32xf32>
    %95 = arith.addf %71, %94 : vector<16x32xf32>
    %96 = vector.extract_strided_slice %18 {offsets = [0, 0, 24], sizes = [2, 8, 8], strides = [1, 1, 1]} : vector<2x8x32xf32> to vector<2x8x8xf32>
    %97 = vector.extract_strided_slice %20 {offsets = [0, 0, 24], sizes = [2, 8, 8], strides = [1, 1, 1]} : vector<2x8x32xf32> to vector<2x8x8xf32>
    %98 = vector.extract_strided_slice %22 {offsets = [0, 0, 24], sizes = [2, 8, 8], strides = [1, 1, 1]} : vector<2x8x32xf32> to vector<2x8x8xf32>
    "tpu.trace_start"() <{level = 10 : i32, message = "bqd,bkd->bqk"}> : () -> ()
    %cst_35 = arith.constant dense<0.000000e+00> : vector<2x8x8xf32>
    %99 = tpu.matmul %96, %97, %cst_35 {dimension_numbers = #tpu.dot_dimension_numbers<[2], [2], [1], [1], [0, 0, 0, 1, 1, 1], [0], [0]>} : vector<2x8x8xf32>, vector<2x8x8xf32>, vector<2x8x8xf32> -> vector<2x8x8xf32>
    "tpu.trace_stop"() : () -> ()
    %cst_36 = arith.constant 0.353553385 : f32
    %100 = vector.broadcast %cst_36 : f32 to vector<2x8x8xf32>
    %101 = arith.mulf %99, %100 : vector<2x8x8xf32>
    %cst_37 = arith.constant -1.000000e+30 : f32
    %102 = vector.shape_cast %7 : vector<1x8x8xi1> to vector<1x8x8xi1>
    %103 = vector.broadcast %102 : vector<1x8x8xi1> to vector<2x8x8xi1>
    %104 = vector.broadcast %cst_37 : f32 to vector<2x8x8xf32>
    %105 = arith.select %103, %101, %104 : vector<2x8x8xi1>, vector<2x8x8xf32>
    %cst_38 = arith.constant dense<0xFF800000> : vector<2x8xf32>
    %106 = vector.multi_reduction <maximumf>, %105, %cst_38 [2] : vector<2x8x8xf32> to vector<2x8xf32>
    %107 = vector.shape_cast %106 : vector<2x8xf32> to vector<2x8x1xf32>
    %108 = vector.broadcast %107 : vector<2x8x1xf32> to vector<2x8x8xf32>
    %109 = arith.subf %105, %108 : vector<2x8x8xf32>
    %110 = math.exp %109 : vector<2x8x8xf32>
    %cst_39 = arith.constant dense<0.000000e+00> : vector<2x8xf32>
    %111 = vector.multi_reduction <add>, %110, %cst_39 [2] : vector<2x8x8xf32> to vector<2x8xf32>
    %112 = vector.shape_cast %111 : vector<2x8xf32> to vector<2x8x1xf32>
    %113 = vector.broadcast %112 : vector<2x8x1xf32> to vector<2x8x8xf32>
    %114 = arith.divf %110, %113 : vector<2x8x8xf32>
    "tpu.trace_start"() <{level = 10 : i32, message = "bqk,bkd->bqd"}> : () -> ()
    %cst_40 = arith.constant dense<0.000000e+00> : vector<2x8x8xf32>
    %115 = tpu.matmul %114, %98, %cst_40 {dimension_numbers = #tpu.dot_dimension_numbers<[2], [1], [1], [2], [0, 0, 0, 1, 1, 2], [0], [0]>} : vector<2x8x8xf32>, vector<2x8x8xf32>, vector<2x8x8xf32> -> vector<2x8x8xf32>
    "tpu.trace_stop"() : () -> ()
    %116 = vector.shape_cast %115 : vector<2x8x8xf32> to vector<16x8xf32>
    %117 = vector.extract_strided_slice %11 {offsets = [24, 0], sizes = [8, 32], strides = [1, 1]} : vector<32x32xf32> to vector<8x32xf32>
    %cst_41 = arith.constant dense<0.000000e+00> : vector<16x32xf32>
    %118 = tpu.matmul %116, %117, %cst_41 {dimension_numbers = #tpu.dot_dimension_numbers<[1], [0], [0], [1], [0, 0, 1, 1], [], []>} : vector<16x8xf32>, vector<8x32xf32>, vector<16x32xf32> -> vector<16x32xf32>
    %119 = arith.addf %95, %118 : vector<16x32xf32>
    %c0_42 = arith.constant 0 : index
    %c0_43 = arith.constant 0 : index
    %c0_44 = arith.constant 0 : index
    %120 = vector.load %arg5[%c0_42, %c0_43, %c0_44] : memref<2x1x32xf32, #tpu.memory_space<vmem>>, vector<1x1x32xf32>
    %121 = vector.shape_cast %120 : vector<1x1x32xf32> to vector<1x32xf32>
    %122 = vector.broadcast %121 : vector<1x32xf32> to vector<16x32xf32>
    %123 = arith.addf %119, %122 : vector<16x32xf32>
    %124 = arith.addf %4, %123 : vector<16x32xf32>
    %c0_45 = arith.constant 0 : index
    %c0_46 = arith.constant 0 : index
    %c0_47 = arith.constant 0 : index
    %125 = vector.load %arg10[%c0_45, %c0_46, %c0_47] : memref<2x1x32xf32, #tpu.memory_space<vmem>>, vector<1x1x32xf32>
    %126 = vector.shape_cast %125 : vector<1x1x32xf32> to vector<1x32xf32>
    %c0_48 = arith.constant 0 : index
    %c0_49 = arith.constant 0 : index
    %c0_50 = arith.constant 0 : index
    %127 = vector.load %arg11[%c0_48, %c0_49, %c0_50] : memref<2x1x32xf32, #tpu.memory_space<vmem>>, vector<1x1x32xf32>
    %128 = vector.shape_cast %127 : vector<1x1x32xf32> to vector<1x32xf32>
    %cst_51 = arith.constant dense<0.000000e+00> : vector<16xf32>
    %129 = vector.multi_reduction <add>, %124, %cst_51 [1] : vector<16x32xf32> to vector<16xf32>
    %130 = vector.shape_cast %129 : vector<16xf32> to vector<16x1xf32>
    %cst_52 = arith.constant 3.200000e+01 : f32
    %131 = vector.broadcast %cst_52 : f32 to vector<16x1xf32>
    %132 = arith.divf %130, %131 : vector<16x1xf32>
    %133 = vector.broadcast %132 : vector<16x1xf32> to vector<16x32xf32>
    %134 = arith.subf %124, %133 : vector<16x32xf32>
    %135 = arith.mulf %134, %134 : vector<16x32xf32>
    %cst_53 = arith.constant dense<0.000000e+00> : vector<16xf32>
    %136 = vector.multi_reduction <add>, %135, %cst_53 [1] : vector<16x32xf32> to vector<16xf32>
    %137 = vector.shape_cast %136 : vector<16xf32> to vector<16x1xf32>
    %cst_54 = arith.constant 3.200000e+01 : f32
    %138 = vector.broadcast %cst_54 : f32 to vector<16x1xf32>
    %139 = arith.divf %137, %138 : vector<16x1xf32>
    %140 = vector.broadcast %132 : vector<16x1xf32> to vector<16x32xf32>
    %141 = arith.subf %124, %140 : vector<16x32xf32>
    %cst_55 = arith.constant 9.99999974E-6 : f32
    %142 = vector.broadcast %cst_55 : f32 to vector<16x1xf32>
    %143 = arith.addf %139, %142 : vector<16x1xf32>
    %144 = math.rsqrt %143 : vector<16x1xf32>
    %145 = vector.broadcast %144 : vector<16x1xf32> to vector<16x32xf32>
    %146 = arith.mulf %141, %145 : vector<16x32xf32>
    %147 = vector.broadcast %126 : vector<1x32xf32> to vector<16x32xf32>
    %148 = arith.mulf %146, %147 : vector<16x32xf32>
    %149 = vector.broadcast %128 : vector<1x32xf32> to vector<16x32xf32>
    %150 = arith.addf %148, %149 : vector<16x32xf32>
    %c0_56 = arith.constant 0 : index
    %c0_57 = arith.constant 0 : index
    %c0_58 = arith.constant 0 : index
    %151 = vector.load %arg6[%c0_56, %c0_57, %c0_58] : memref<2x32x64xf32, #tpu.memory_space<vmem>>, vector<1x32x64xf32>
    %152 = vector.shape_cast %151 : vector<1x32x64xf32> to vector<32x64xf32>
    %cst_59 = arith.constant dense<0.000000e+00> : vector<16x64xf32>
    %153 = tpu.matmul %150, %152, %cst_59 {dimension_numbers = #tpu.dot_dimension_numbers<[1], [0], [0], [1], [0, 0, 1, 1], [], []>} : vector<16x32xf32>, vector<32x64xf32>, vector<16x64xf32> -> vector<16x64xf32>
    %c0_60 = arith.constant 0 : index
    %c0_61 = arith.constant 0 : index
    %c0_62 = arith.constant 0 : index
    %154 = vector.load %arg7[%c0_60, %c0_61, %c0_62] : memref<2x1x64xf32, #tpu.memory_space<vmem>>, vector<1x1x64xf32>
    %155 = vector.shape_cast %154 : vector<1x1x64xf32> to vector<1x64xf32>
    %156 = vector.broadcast %155 : vector<1x64xf32> to vector<16x64xf32>
    %157 = arith.addf %153, %156 : vector<16x64xf32>
    %cst_63 = arith.constant 5.000000e-01 : f32
    %158 = vector.broadcast %cst_63 : f32 to vector<16x64xf32>
    %159 = arith.mulf %158, %157 : vector<16x64xf32>
    %cst_64 = arith.constant 0.707106769 : f32
    %160 = vector.broadcast %cst_64 : f32 to vector<16x64xf32>
    %161 = arith.mulf %157, %160 : vector<16x64xf32>
    %162 = math.erf %161 : vector<16x64xf32>
    %cst_65 = arith.constant 1.000000e+00 : f32
    %163 = vector.broadcast %cst_65 : f32 to vector<16x64xf32>
    %164 = arith.addf %163, %162 : vector<16x64xf32>
    %165 = arith.mulf %159, %164 : vector<16x64xf32>
    %c0_66 = arith.constant 0 : index
    %c0_67 = arith.constant 0 : index
    %c0_68 = arith.constant 0 : index
    %166 = vector.load %arg8[%c0_66, %c0_67, %c0_68] : memref<2x64x32xf32, #tpu.memory_space<vmem>>, vector<1x64x32xf32>
    %167 = vector.shape_cast %166 : vector<1x64x32xf32> to vector<64x32xf32>
    %cst_69 = arith.constant dense<0.000000e+00> : vector<16x32xf32>
    %168 = tpu.matmul %165, %167, %cst_69 {dimension_numbers = #tpu.dot_dimension_numbers<[1], [0], [0], [1], [0, 0, 1, 1], [], []>} : vector<16x64xf32>, vector<64x32xf32>, vector<16x32xf32> -> vector<16x32xf32>
    %c0_70 = arith.constant 0 : index
    %c0_71 = arith.constant 0 : index
    %c0_72 = arith.constant 0 : index
    %169 = vector.load %arg9[%c0_70, %c0_71, %c0_72] : memref<2x1x32xf32, #tpu.memory_space<vmem>>, vector<1x1x32xf32>
    %170 = vector.shape_cast %169 : vector<1x1x32xf32> to vector<1x32xf32>
    %171 = vector.broadcast %170 : vector<1x32xf32> to vector<16x32xf32>
    %172 = arith.addf %168, %171 : vector<16x32xf32>
    %173 = arith.addf %150, %172 : vector<16x32xf32>
    %c0_73 = arith.constant 0 : index
    %c0_74 = arith.constant 0 : index
    %c0_75 = arith.constant 0 : index
    %174 = vector.load %arg12[%c0_73, %c0_74, %c0_75] : memref<2x1x32xf32, #tpu.memory_space<vmem>>, vector<1x1x32xf32>
    %175 = vector.shape_cast %174 : vector<1x1x32xf32> to vector<1x32xf32>
    %c0_76 = arith.constant 0 : index
    %c0_77 = arith.constant 0 : index
    %c0_78 = arith.constant 0 : index
    %176 = vector.load %arg13[%c0_76, %c0_77, %c0_78] : memref<2x1x32xf32, #tpu.memory_space<vmem>>, vector<1x1x32xf32>
    %177 = vector.shape_cast %176 : vector<1x1x32xf32> to vector<1x32xf32>
    %cst_79 = arith.constant dense<0.000000e+00> : vector<16xf32>
    %178 = vector.multi_reduction <add>, %173, %cst_79 [1] : vector<16x32xf32> to vector<16xf32>
    %179 = vector.shape_cast %178 : vector<16xf32> to vector<16x1xf32>
    %cst_80 = arith.constant 3.200000e+01 : f32
    %180 = vector.broadcast %cst_80 : f32 to vector<16x1xf32>
    %181 = arith.divf %179, %180 : vector<16x1xf32>
    %182 = vector.broadcast %181 : vector<16x1xf32> to vector<16x32xf32>
    %183 = arith.subf %173, %182 : vector<16x32xf32>
    %184 = arith.mulf %183, %183 : vector<16x32xf32>
    %cst_81 = arith.constant dense<0.000000e+00> : vector<16xf32>
    %185 = vector.multi_reduction <add>, %184, %cst_81 [1] : vector<16x32xf32> to vector<16xf32>
    %186 = vector.shape_cast %185 : vector<16xf32> to vector<16x1xf32>
    %cst_82 = arith.constant 3.200000e+01 : f32
    %187 = vector.broadcast %cst_82 : f32 to vector<16x1xf32>
    %188 = arith.divf %186, %187 : vector<16x1xf32>
    %189 = vector.broadcast %181 : vector<16x1xf32> to vector<16x32xf32>
    %190 = arith.subf %173, %189 : vector<16x32xf32>
    %cst_83 = arith.constant 9.99999974E-6 : f32
    %191 = vector.broadcast %cst_83 : f32 to vector<16x1xf32>
    %192 = arith.addf %188, %191 : vector<16x1xf32>
    %193 = math.rsqrt %192 : vector<16x1xf32>
    %194 = vector.broadcast %193 : vector<16x1xf32> to vector<16x32xf32>
    %195 = arith.mulf %190, %194 : vector<16x32xf32>
    %196 = vector.broadcast %175 : vector<1x32xf32> to vector<16x32xf32>
    %197 = arith.mulf %195, %196 : vector<16x32xf32>
    %198 = vector.broadcast %177 : vector<1x32xf32> to vector<16x32xf32>
    %199 = arith.addf %197, %198 : vector<16x32xf32>
    %c1 = arith.constant 1 : index
    %c0_84 = arith.constant 0 : index
    %c0_85 = arith.constant 0 : index
    %200 = vector.load %arg2[%c1, %c0_84, %c0_85] : memref<2x32x96xf32, #tpu.memory_space<vmem>>, vector<1x32x96xf32>
    %201 = vector.shape_cast %200 : vector<1x32x96xf32> to vector<32x96xf32>
    %c1_86 = arith.constant 1 : index
    %c0_87 = arith.constant 0 : index
    %c0_88 = arith.constant 0 : index
    %202 = vector.load %arg4[%c1_86, %c0_87, %c0_88] : memref<2x32x32xf32, #tpu.memory_space<vmem>>, vector<1x32x32xf32>
    %203 = vector.shape_cast %202 : vector<1x32x32xf32> to vector<32x32xf32>
    %cst_89 = arith.constant dense<0.000000e+00> : vector<16x96xf32>
    %204 = tpu.matmul %199, %201, %cst_89 {dimension_numbers = #tpu.dot_dimension_numbers<[1], [0], [0], [1], [0, 0, 1, 1], [], []>} : vector<16x32xf32>, vector<32x96xf32>, vector<16x96xf32> -> vector<16x96xf32>
    %c1_90 = arith.constant 1 : index
    %c0_91 = arith.constant 0 : index
    %c0_92 = arith.constant 0 : index
    %205 = vector.load %arg3[%c1_90, %c0_91, %c0_92] : memref<2x1x96xf32, #tpu.memory_space<vmem>>, vector<1x1x96xf32>
    %206 = vector.shape_cast %205 : vector<1x1x96xf32> to vector<1x96xf32>
    %207 = vector.broadcast %206 : vector<1x96xf32> to vector<16x96xf32>
    %208 = arith.addf %204, %207 : vector<16x96xf32>
    %209 = vector.extract_strided_slice %208 {offsets = [0, 0], sizes = [16, 32], strides = [1, 1]} : vector<16x96xf32> to vector<16x32xf32>
    %210 = vector.shape_cast %209 : vector<16x32xf32> to vector<2x8x32xf32>
    %211 = vector.extract_strided_slice %208 {offsets = [0, 32], sizes = [16, 32], strides = [1, 1]} : vector<16x96xf32> to vector<16x32xf32>
    %212 = vector.shape_cast %211 : vector<16x32xf32> to vector<2x8x32xf32>
    %213 = vector.extract_strided_slice %208 {offsets = [0, 64], sizes = [16, 32], strides = [1, 1]} : vector<16x96xf32> to vector<16x32xf32>
    %214 = vector.shape_cast %213 : vector<16x32xf32> to vector<2x8x32xf32>
    %cst_93 = arith.constant 0.000000e+00 : f32
    %215 = vector.broadcast %cst_93 : f32 to vector<16x32xf32>
    %216 = vector.extract_strided_slice %210 {offsets = [0, 0, 0], sizes = [2, 8, 8], strides = [1, 1, 1]} : vector<2x8x32xf32> to vector<2x8x8xf32>
    %217 = vector.extract_strided_slice %212 {offsets = [0, 0, 0], sizes = [2, 8, 8], strides = [1, 1, 1]} : vector<2x8x32xf32> to vector<2x8x8xf32>
    %218 = vector.extract_strided_slice %214 {offsets = [0, 0, 0], sizes = [2, 8, 8], strides = [1, 1, 1]} : vector<2x8x32xf32> to vector<2x8x8xf32>
    "tpu.trace_start"() <{level = 10 : i32, message = "bqd,bkd->bqk"}> : () -> ()
    %cst_94 = arith.constant dense<0.000000e+00> : vector<2x8x8xf32>
    %219 = tpu.matmul %216, %217, %cst_94 {dimension_numbers = #tpu.dot_dimension_numbers<[2], [2], [1], [1], [0, 0, 0, 1, 1, 1], [0], [0]>} : vector<2x8x8xf32>, vector<2x8x8xf32>, vector<2x8x8xf32> -> vector<2x8x8xf32>
    "tpu.trace_stop"() : () -> ()
    %cst_95 = arith.constant 0.353553385 : f32
    %220 = vector.broadcast %cst_95 : f32 to vector<2x8x8xf32>
    %221 = arith.mulf %219, %220 : vector<2x8x8xf32>
    %cst_96 = arith.constant -1.000000e+30 : f32
    %222 = vector.shape_cast %7 : vector<1x8x8xi1> to vector<1x8x8xi1>
    %223 = vector.broadcast %222 : vector<1x8x8xi1> to vector<2x8x8xi1>
    %224 = vector.broadcast %cst_96 : f32 to vector<2x8x8xf32>
    %225 = arith.select %223, %221, %224 : vector<2x8x8xi1>, vector<2x8x8xf32>
    %cst_97 = arith.constant dense<0xFF800000> : vector<2x8xf32>
    %226 = vector.multi_reduction <maximumf>, %225, %cst_97 [2] : vector<2x8x8xf32> to vector<2x8xf32>
    %227 = vector.shape_cast %226 : vector<2x8xf32> to vector<2x8x1xf32>
    %228 = vector.broadcast %227 : vector<2x8x1xf32> to vector<2x8x8xf32>
    %229 = arith.subf %225, %228 : vector<2x8x8xf32>
    %230 = math.exp %229 : vector<2x8x8xf32>
    %cst_98 = arith.constant dense<0.000000e+00> : vector<2x8xf32>
    %231 = vector.multi_reduction <add>, %230, %cst_98 [2] : vector<2x8x8xf32> to vector<2x8xf32>
    %232 = vector.shape_cast %231 : vector<2x8xf32> to vector<2x8x1xf32>
    %233 = vector.broadcast %232 : vector<2x8x1xf32> to vector<2x8x8xf32>
    %234 = arith.divf %230, %233 : vector<2x8x8xf32>
    "tpu.trace_start"() <{level = 10 : i32, message = "bqk,bkd->bqd"}> : () -> ()
    %cst_99 = arith.constant dense<0.000000e+00> : vector<2x8x8xf32>
    %235 = tpu.matmul %234, %218, %cst_99 {dimension_numbers = #tpu.dot_dimension_numbers<[2], [1], [1], [2], [0, 0, 0, 1, 1, 2], [0], [0]>} : vector<2x8x8xf32>, vector<2x8x8xf32>, vector<2x8x8xf32> -> vector<2x8x8xf32>
    "tpu.trace_stop"() : () -> ()
    %236 = vector.shape_cast %235 : vector<2x8x8xf32> to vector<16x8xf32>
    %237 = vector.extract_strided_slice %203 {offsets = [0, 0], sizes = [8, 32], strides = [1, 1]} : vector<32x32xf32> to vector<8x32xf32>
    %cst_100 = arith.constant dense<0.000000e+00> : vector<16x32xf32>
    %238 = tpu.matmul %236, %237, %cst_100 {dimension_numbers = #tpu.dot_dimension_numbers<[1], [0], [0], [1], [0, 0, 1, 1], [], []>} : vector<16x8xf32>, vector<8x32xf32>, vector<16x32xf32> -> vector<16x32xf32>
    %239 = arith.addf %215, %238 : vector<16x32xf32>
    %240 = vector.extract_strided_slice %210 {offsets = [0, 0, 8], sizes = [2, 8, 8], strides = [1, 1, 1]} : vector<2x8x32xf32> to vector<2x8x8xf32>
    %241 = vector.extract_strided_slice %212 {offsets = [0, 0, 8], sizes = [2, 8, 8], strides = [1, 1, 1]} : vector<2x8x32xf32> to vector<2x8x8xf32>
    %242 = vector.extract_strided_slice %214 {offsets = [0, 0, 8], sizes = [2, 8, 8], strides = [1, 1, 1]} : vector<2x8x32xf32> to vector<2x8x8xf32>
    "tpu.trace_start"() <{level = 10 : i32, message = "bqd,bkd->bqk"}> : () -> ()
    %cst_101 = arith.constant dense<0.000000e+00> : vector<2x8x8xf32>
    %243 = tpu.matmul %240, %241, %cst_101 {dimension_numbers = #tpu.dot_dimension_numbers<[2], [2], [1], [1], [0, 0, 0, 1, 1, 1], [0], [0]>} : vector<2x8x8xf32>, vector<2x8x8xf32>, vector<2x8x8xf32> -> vector<2x8x8xf32>
    "tpu.trace_stop"() : () -> ()
    %cst_102 = arith.constant 0.353553385 : f32
    %244 = vector.broadcast %cst_102 : f32 to vector<2x8x8xf32>
    %245 = arith.mulf %243, %244 : vector<2x8x8xf32>
    %cst_103 = arith.constant -1.000000e+30 : f32
    %246 = vector.shape_cast %7 : vector<1x8x8xi1> to vector<1x8x8xi1>
    %247 = vector.broadcast %246 : vector<1x8x8xi1> to vector<2x8x8xi1>
    %248 = vector.broadcast %cst_103 : f32 to vector<2x8x8xf32>
    %249 = arith.select %247, %245, %248 : vector<2x8x8xi1>, vector<2x8x8xf32>
    %cst_104 = arith.constant dense<0xFF800000> : vector<2x8xf32>
    %250 = vector.multi_reduction <maximumf>, %249, %cst_104 [2] : vector<2x8x8xf32> to vector<2x8xf32>
    %251 = vector.shape_cast %250 : vector<2x8xf32> to vector<2x8x1xf32>
    %252 = vector.broadcast %251 : vector<2x8x1xf32> to vector<2x8x8xf32>
    %253 = arith.subf %249, %252 : vector<2x8x8xf32>
    %254 = math.exp %253 : vector<2x8x8xf32>
    %cst_105 = arith.constant dense<0.000000e+00> : vector<2x8xf32>
    %255 = vector.multi_reduction <add>, %254, %cst_105 [2] : vector<2x8x8xf32> to vector<2x8xf32>
    %256 = vector.shape_cast %255 : vector<2x8xf32> to vector<2x8x1xf32>
    %257 = vector.broadcast %256 : vector<2x8x1xf32> to vector<2x8x8xf32>
    %258 = arith.divf %254, %257 : vector<2x8x8xf32>
    "tpu.trace_start"() <{level = 10 : i32, message = "bqk,bkd->bqd"}> : () -> ()
    %cst_106 = arith.constant dense<0.000000e+00> : vector<2x8x8xf32>
    %259 = tpu.matmul %258, %242, %cst_106 {dimension_numbers = #tpu.dot_dimension_numbers<[2], [1], [1], [2], [0, 0, 0, 1, 1, 2], [0], [0]>} : vector<2x8x8xf32>, vector<2x8x8xf32>, vector<2x8x8xf32> -> vector<2x8x8xf32>
    "tpu.trace_stop"() : () -> ()
    %260 = vector.shape_cast %259 : vector<2x8x8xf32> to vector<16x8xf32>
    %261 = vector.extract_strided_slice %203 {offsets = [8, 0], sizes = [8, 32], strides = [1, 1]} : vector<32x32xf32> to vector<8x32xf32>
    %cst_107 = arith.constant dense<0.000000e+00> : vector<16x32xf32>
    %262 = tpu.matmul %260, %261, %cst_107 {dimension_numbers = #tpu.dot_dimension_numbers<[1], [0], [0], [1], [0, 0, 1, 1], [], []>} : vector<16x8xf32>, vector<8x32xf32>, vector<16x32xf32> -> vector<16x32xf32>
    %263 = arith.addf %239, %262 : vector<16x32xf32>
    %264 = vector.extract_strided_slice %210 {offsets = [0, 0, 16], sizes = [2, 8, 8], strides = [1, 1, 1]} : vector<2x8x32xf32> to vector<2x8x8xf32>
    %265 = vector.extract_strided_slice %212 {offsets = [0, 0, 16], sizes = [2, 8, 8], strides = [1, 1, 1]} : vector<2x8x32xf32> to vector<2x8x8xf32>
    %266 = vector.extract_strided_slice %214 {offsets = [0, 0, 16], sizes = [2, 8, 8], strides = [1, 1, 1]} : vector<2x8x32xf32> to vector<2x8x8xf32>
    "tpu.trace_start"() <{level = 10 : i32, message = "bqd,bkd->bqk"}> : () -> ()
    %cst_108 = arith.constant dense<0.000000e+00> : vector<2x8x8xf32>
    %267 = tpu.matmul %264, %265, %cst_108 {dimension_numbers = #tpu.dot_dimension_numbers<[2], [2], [1], [1], [0, 0, 0, 1, 1, 1], [0], [0]>} : vector<2x8x8xf32>, vector<2x8x8xf32>, vector<2x8x8xf32> -> vector<2x8x8xf32>
    "tpu.trace_stop"() : () -> ()
    %cst_109 = arith.constant 0.353553385 : f32
    %268 = vector.broadcast %cst_109 : f32 to vector<2x8x8xf32>
    %269 = arith.mulf %267, %268 : vector<2x8x8xf32>
    %cst_110 = arith.constant -1.000000e+30 : f32
    %270 = vector.shape_cast %7 : vector<1x8x8xi1> to vector<1x8x8xi1>
    %271 = vector.broadcast %270 : vector<1x8x8xi1> to vector<2x8x8xi1>
    %272 = vector.broadcast %cst_110 : f32 to vector<2x8x8xf32>
    %273 = arith.select %271, %269, %272 : vector<2x8x8xi1>, vector<2x8x8xf32>
    %cst_111 = arith.constant dense<0xFF800000> : vector<2x8xf32>
    %274 = vector.multi_reduction <maximumf>, %273, %cst_111 [2] : vector<2x8x8xf32> to vector<2x8xf32>
    %275 = vector.shape_cast %274 : vector<2x8xf32> to vector<2x8x1xf32>
    %276 = vector.broadcast %275 : vector<2x8x1xf32> to vector<2x8x8xf32>
    %277 = arith.subf %273, %276 : vector<2x8x8xf32>
    %278 = math.exp %277 : vector<2x8x8xf32>
    %cst_112 = arith.constant dense<0.000000e+00> : vector<2x8xf32>
    %279 = vector.multi_reduction <add>, %278, %cst_112 [2] : vector<2x8x8xf32> to vector<2x8xf32>
    %280 = vector.shape_cast %279 : vector<2x8xf32> to vector<2x8x1xf32>
    %281 = vector.broadcast %280 : vector<2x8x1xf32> to vector<2x8x8xf32>
    %282 = arith.divf %278, %281 : vector<2x8x8xf32>
    "tpu.trace_start"() <{level = 10 : i32, message = "bqk,bkd->bqd"}> : () -> ()
    %cst_113 = arith.constant dense<0.000000e+00> : vector<2x8x8xf32>
    %283 = tpu.matmul %282, %266, %cst_113 {dimension_numbers = #tpu.dot_dimension_numbers<[2], [1], [1], [2], [0, 0, 0, 1, 1, 2], [0], [0]>} : vector<2x8x8xf32>, vector<2x8x8xf32>, vector<2x8x8xf32> -> vector<2x8x8xf32>
    "tpu.trace_stop"() : () -> ()
    %284 = vector.shape_cast %283 : vector<2x8x8xf32> to vector<16x8xf32>
    %285 = vector.extract_strided_slice %203 {offsets = [16, 0], sizes = [8, 32], strides = [1, 1]} : vector<32x32xf32> to vector<8x32xf32>
    %cst_114 = arith.constant dense<0.000000e+00> : vector<16x32xf32>
    %286 = tpu.matmul %284, %285, %cst_114 {dimension_numbers = #tpu.dot_dimension_numbers<[1], [0], [0], [1], [0, 0, 1, 1], [], []>} : vector<16x8xf32>, vector<8x32xf32>, vector<16x32xf32> -> vector<16x32xf32>
    %287 = arith.addf %263, %286 : vector<16x32xf32>
    %288 = vector.extract_strided_slice %210 {offsets = [0, 0, 24], sizes = [2, 8, 8], strides = [1, 1, 1]} : vector<2x8x32xf32> to vector<2x8x8xf32>
    %289 = vector.extract_strided_slice %212 {offsets = [0, 0, 24], sizes = [2, 8, 8], strides = [1, 1, 1]} : vector<2x8x32xf32> to vector<2x8x8xf32>
    %290 = vector.extract_strided_slice %214 {offsets = [0, 0, 24], sizes = [2, 8, 8], strides = [1, 1, 1]} : vector<2x8x32xf32> to vector<2x8x8xf32>
    "tpu.trace_start"() <{level = 10 : i32, message = "bqd,bkd->bqk"}> : () -> ()
    %cst_115 = arith.constant dense<0.000000e+00> : vector<2x8x8xf32>
    %291 = tpu.matmul %288, %289, %cst_115 {dimension_numbers = #tpu.dot_dimension_numbers<[2], [2], [1], [1], [0, 0, 0, 1, 1, 1], [0], [0]>} : vector<2x8x8xf32>, vector<2x8x8xf32>, vector<2x8x8xf32> -> vector<2x8x8xf32>
    "tpu.trace_stop"() : () -> ()
    %cst_116 = arith.constant 0.353553385 : f32
    %292 = vector.broadcast %cst_116 : f32 to vector<2x8x8xf32>
    %293 = arith.mulf %291, %292 : vector<2x8x8xf32>
    %cst_117 = arith.constant -1.000000e+30 : f32
    %294 = vector.shape_cast %7 : vector<1x8x8xi1> to vector<1x8x8xi1>
    %295 = vector.broadcast %294 : vector<1x8x8xi1> to vector<2x8x8xi1>
    %296 = vector.broadcast %cst_117 : f32 to vector<2x8x8xf32>
    %297 = arith.select %295, %293, %296 : vector<2x8x8xi1>, vector<2x8x8xf32>
    %cst_118 = arith.constant dense<0xFF800000> : vector<2x8xf32>
    %298 = vector.multi_reduction <maximumf>, %297, %cst_118 [2] : vector<2x8x8xf32> to vector<2x8xf32>
    %299 = vector.shape_cast %298 : vector<2x8xf32> to vector<2x8x1xf32>
    %300 = vector.broadcast %299 : vector<2x8x1xf32> to vector<2x8x8xf32>
    %301 = arith.subf %297, %300 : vector<2x8x8xf32>
    %302 = math.exp %301 : vector<2x8x8xf32>
    %cst_119 = arith.constant dense<0.000000e+00> : vector<2x8xf32>
    %303 = vector.multi_reduction <add>, %302, %cst_119 [2] : vector<2x8x8xf32> to vector<2x8xf32>
    %304 = vector.shape_cast %303 : vector<2x8xf32> to vector<2x8x1xf32>
    %305 = vector.broadcast %304 : vector<2x8x1xf32> to vector<2x8x8xf32>
    %306 = arith.divf %302, %305 : vector<2x8x8xf32>
    "tpu.trace_start"() <{level = 10 : i32, message = "bqk,bkd->bqd"}> : () -> ()
    %cst_120 = arith.constant dense<0.000000e+00> : vector<2x8x8xf32>
    %307 = tpu.matmul %306, %290, %cst_120 {dimension_numbers = #tpu.dot_dimension_numbers<[2], [1], [1], [2], [0, 0, 0, 1, 1, 2], [0], [0]>} : vector<2x8x8xf32>, vector<2x8x8xf32>, vector<2x8x8xf32> -> vector<2x8x8xf32>
    "tpu.trace_stop"() : () -> ()
    %308 = vector.shape_cast %307 : vector<2x8x8xf32> to vector<16x8xf32>
    %309 = vector.extract_strided_slice %203 {offsets = [24, 0], sizes = [8, 32], strides = [1, 1]} : vector<32x32xf32> to vector<8x32xf32>
    %cst_121 = arith.constant dense<0.000000e+00> : vector<16x32xf32>
    %310 = tpu.matmul %308, %309, %cst_121 {dimension_numbers = #tpu.dot_dimension_numbers<[1], [0], [0], [1], [0, 0, 1, 1], [], []>} : vector<16x8xf32>, vector<8x32xf32>, vector<16x32xf32> -> vector<16x32xf32>
    %311 = arith.addf %287, %310 : vector<16x32xf32>
    %c1_122 = arith.constant 1 : index
    %c0_123 = arith.constant 0 : index
    %c0_124 = arith.constant 0 : index
    %312 = vector.load %arg5[%c1_122, %c0_123, %c0_124] : memref<2x1x32xf32, #tpu.memory_space<vmem>>, vector<1x1x32xf32>
    %313 = vector.shape_cast %312 : vector<1x1x32xf32> to vector<1x32xf32>
    %314 = vector.broadcast %313 : vector<1x32xf32> to vector<16x32xf32>
    %315 = arith.addf %311, %314 : vector<16x32xf32>
    %316 = arith.addf %199, %315 : vector<16x32xf32>
    %c1_125 = arith.constant 1 : index
    %c0_126 = arith.constant 0 : index
    %c0_127 = arith.constant 0 : index
    %317 = vector.load %arg10[%c1_125, %c0_126, %c0_127] : memref<2x1x32xf32, #tpu.memory_space<vmem>>, vector<1x1x32xf32>
    %318 = vector.shape_cast %317 : vector<1x1x32xf32> to vector<1x32xf32>
    %c1_128 = arith.constant 1 : index
    %c0_129 = arith.constant 0 : index
    %c0_130 = arith.constant 0 : index
    %319 = vector.load %arg11[%c1_128, %c0_129, %c0_130] : memref<2x1x32xf32, #tpu.memory_space<vmem>>, vector<1x1x32xf32>
    %320 = vector.shape_cast %319 : vector<1x1x32xf32> to vector<1x32xf32>
    %cst_131 = arith.constant dense<0.000000e+00> : vector<16xf32>
    %321 = vector.multi_reduction <add>, %316, %cst_131 [1] : vector<16x32xf32> to vector<16xf32>
    %322 = vector.shape_cast %321 : vector<16xf32> to vector<16x1xf32>
    %cst_132 = arith.constant 3.200000e+01 : f32
    %323 = vector.broadcast %cst_132 : f32 to vector<16x1xf32>
    %324 = arith.divf %322, %323 : vector<16x1xf32>
    %325 = vector.broadcast %324 : vector<16x1xf32> to vector<16x32xf32>
    %326 = arith.subf %316, %325 : vector<16x32xf32>
    %327 = arith.mulf %326, %326 : vector<16x32xf32>
    %cst_133 = arith.constant dense<0.000000e+00> : vector<16xf32>
    %328 = vector.multi_reduction <add>, %327, %cst_133 [1] : vector<16x32xf32> to vector<16xf32>
    %329 = vector.shape_cast %328 : vector<16xf32> to vector<16x1xf32>
    %cst_134 = arith.constant 3.200000e+01 : f32
    %330 = vector.broadcast %cst_134 : f32 to vector<16x1xf32>
    %331 = arith.divf %329, %330 : vector<16x1xf32>
    %332 = vector.broadcast %324 : vector<16x1xf32> to vector<16x32xf32>
    %333 = arith.subf %316, %332 : vector<16x32xf32>
    %cst_135 = arith.constant 9.99999974E-6 : f32
    %334 = vector.broadcast %cst_135 : f32 to vector<16x1xf32>
    %335 = arith.addf %331, %334 : vector<16x1xf32>
    %336 = math.rsqrt %335 : vector<16x1xf32>
    %337 = vector.broadcast %336 : vector<16x1xf32> to vector<16x32xf32>
    %338 = arith.mulf %333, %337 : vector<16x32xf32>
    %339 = vector.broadcast %318 : vector<1x32xf32> to vector<16x32xf32>
    %340 = arith.mulf %338, %339 : vector<16x32xf32>
    %341 = vector.broadcast %320 : vector<1x32xf32> to vector<16x32xf32>
    %342 = arith.addf %340, %341 : vector<16x32xf32>
    %c1_136 = arith.constant 1 : index
    %c0_137 = arith.constant 0 : index
    %c0_138 = arith.constant 0 : index
    %343 = vector.load %arg6[%c1_136, %c0_137, %c0_138] : memref<2x32x64xf32, #tpu.memory_space<vmem>>, vector<1x32x64xf32>
    %344 = vector.shape_cast %343 : vector<1x32x64xf32> to vector<32x64xf32>
    %cst_139 = arith.constant dense<0.000000e+00> : vector<16x64xf32>
    %345 = tpu.matmul %342, %344, %cst_139 {dimension_numbers = #tpu.dot_dimension_numbers<[1], [0], [0], [1], [0, 0, 1, 1], [], []>} : vector<16x32xf32>, vector<32x64xf32>, vector<16x64xf32> -> vector<16x64xf32>
    %c1_140 = arith.constant 1 : index
    %c0_141 = arith.constant 0 : index
    %c0_142 = arith.constant 0 : index
    %346 = vector.load %arg7[%c1_140, %c0_141, %c0_142] : memref<2x1x64xf32, #tpu.memory_space<vmem>>, vector<1x1x64xf32>
    %347 = vector.shape_cast %346 : vector<1x1x64xf32> to vector<1x64xf32>
    %348 = vector.broadcast %347 : vector<1x64xf32> to vector<16x64xf32>
    %349 = arith.addf %345, %348 : vector<16x64xf32>
    %cst_143 = arith.constant 5.000000e-01 : f32
    %350 = vector.broadcast %cst_143 : f32 to vector<16x64xf32>
    %351 = arith.mulf %350, %349 : vector<16x64xf32>
    %cst_144 = arith.constant 0.707106769 : f32
    %352 = vector.broadcast %cst_144 : f32 to vector<16x64xf32>
    %353 = arith.mulf %349, %352 : vector<16x64xf32>
    %354 = math.erf %353 : vector<16x64xf32>
    %cst_145 = arith.constant 1.000000e+00 : f32
    %355 = vector.broadcast %cst_145 : f32 to vector<16x64xf32>
    %356 = arith.addf %355, %354 : vector<16x64xf32>
    %357 = arith.mulf %351, %356 : vector<16x64xf32>
    %c1_146 = arith.constant 1 : index
    %c0_147 = arith.constant 0 : index
    %c0_148 = arith.constant 0 : index
    %358 = vector.load %arg8[%c1_146, %c0_147, %c0_148] : memref<2x64x32xf32, #tpu.memory_space<vmem>>, vector<1x64x32xf32>
    %359 = vector.shape_cast %358 : vector<1x64x32xf32> to vector<64x32xf32>
    %cst_149 = arith.constant dense<0.000000e+00> : vector<16x32xf32>
    %360 = tpu.matmul %357, %359, %cst_149 {dimension_numbers = #tpu.dot_dimension_numbers<[1], [0], [0], [1], [0, 0, 1, 1], [], []>} : vector<16x64xf32>, vector<64x32xf32>, vector<16x32xf32> -> vector<16x32xf32>
    %c1_150 = arith.constant 1 : index
    %c0_151 = arith.constant 0 : index
    %c0_152 = arith.constant 0 : index
    %361 = vector.load %arg9[%c1_150, %c0_151, %c0_152] : memref<2x1x32xf32, #tpu.memory_space<vmem>>, vector<1x1x32xf32>
    %362 = vector.shape_cast %361 : vector<1x1x32xf32> to vector<1x32xf32>
    %363 = vector.broadcast %362 : vector<1x32xf32> to vector<16x32xf32>
    %364 = arith.addf %360, %363 : vector<16x32xf32>
    %365 = arith.addf %342, %364 : vector<16x32xf32>
    %c1_153 = arith.constant 1 : index
    %c0_154 = arith.constant 0 : index
    %c0_155 = arith.constant 0 : index
    %366 = vector.load %arg12[%c1_153, %c0_154, %c0_155] : memref<2x1x32xf32, #tpu.memory_space<vmem>>, vector<1x1x32xf32>
    %367 = vector.shape_cast %366 : vector<1x1x32xf32> to vector<1x32xf32>
    %c1_156 = arith.constant 1 : index
    %c0_157 = arith.constant 0 : index
    %c0_158 = arith.constant 0 : index
    %368 = vector.load %arg13[%c1_156, %c0_157, %c0_158] : memref<2x1x32xf32, #tpu.memory_space<vmem>>, vector<1x1x32xf32>
    %369 = vector.shape_cast %368 : vector<1x1x32xf32> to vector<1x32xf32>
    %cst_159 = arith.constant dense<0.000000e+00> : vector<16xf32>
    %370 = vector.multi_reduction <add>, %365, %cst_159 [1] : vector<16x32xf32> to vector<16xf32>
    %371 = vector.shape_cast %370 : vector<16xf32> to vector<16x1xf32>
    %cst_160 = arith.constant 3.200000e+01 : f32
    %372 = vector.broadcast %cst_160 : f32 to vector<16x1xf32>
    %373 = arith.divf %371, %372 : vector<16x1xf32>
    %374 = vector.broadcast %373 : vector<16x1xf32> to vector<16x32xf32>
    %375 = arith.subf %365, %374 : vector<16x32xf32>
    %376 = arith.mulf %375, %375 : vector<16x32xf32>
    %cst_161 = arith.constant dense<0.000000e+00> : vector<16xf32>
    %377 = vector.multi_reduction <add>, %376, %cst_161 [1] : vector<16x32xf32> to vector<16xf32>
    %378 = vector.shape_cast %377 : vector<16xf32> to vector<16x1xf32>
    %cst_162 = arith.constant 3.200000e+01 : f32
    %379 = vector.broadcast %cst_162 : f32 to vector<16x1xf32>
    %380 = arith.divf %378, %379 : vector<16x1xf32>
    %381 = vector.broadcast %373 : vector<16x1xf32> to vector<16x32xf32>
    %382 = arith.subf %365, %381 : vector<16x32xf32>
    %cst_163 = arith.constant 9.99999974E-6 : f32
    %383 = vector.broadcast %cst_163 : f32 to vector<16x1xf32>
    %384 = arith.addf %380, %383 : vector<16x1xf32>
    %385 = math.rsqrt %384 : vector<16x1xf32>
    %386 = vector.broadcast %385 : vector<16x1xf32> to vector<16x32xf32>
    %387 = arith.mulf %382, %386 : vector<16x32xf32>
    %388 = vector.broadcast %367 : vector<1x32xf32> to vector<16x32xf32>
    %389 = arith.mulf %387, %388 : vector<16x32xf32>
    %390 = vector.broadcast %369 : vector<1x32xf32> to vector<16x32xf32>
    %391 = arith.addf %389, %390 : vector<16x32xf32>
    %c0_164 = arith.constant 0 : index
    %c0_165 = arith.constant 0 : index
    %392 = vector.load %arg14[%c0_164, %c0_165] : memref<32x128xf32, #tpu.memory_space<vmem>>, vector<32x128xf32>
    %cst_166 = arith.constant dense<0.000000e+00> : vector<16x128xf32>
    %393 = tpu.matmul %391, %392, %cst_166 {dimension_numbers = #tpu.dot_dimension_numbers<[1], [0], [0], [1], [0, 0, 1, 1], [], []>} : vector<16x32xf32>, vector<32x128xf32>, vector<16x128xf32> -> vector<16x128xf32>
    %c0_167 = arith.constant 0 : index
    %c0_168 = arith.constant 0 : index
    %394 = vector.load %arg15[%c0_167, %c0_168] : memref<1x128xf32, #tpu.memory_space<vmem>>, vector<1x128xf32>
    %395 = vector.broadcast %394 : vector<1x128xf32> to vector<16x128xf32>
    %396 = arith.addf %393, %395 : vector<16x128xf32>
    %c0_169 = arith.constant 0 : index
    %c0_170 = arith.constant 0 : index
    %397 = vector.load %arg16[%c0_169, %c0_170] : memref<16x128xf32, #tpu.memory_space<vmem>>, vector<16x128xf32>
    tpu.vector_store %arg16[%c0_169, %c0_170], %396 {strides = array<i32>} : memref<16x128xf32, #tpu.memory_space<vmem>>, vector<16x128xf32>,
    return
  }
}

</mosaic_0001>

<bundles_post_ra>
// kernel: tpu_custom_call.1
= control target key start
LH: loop header
LB: loop body
LE: loop exit
PB: predicated region body
PF: predicated region fallthrough
CT: control target
= control target key end

     0   :  { %s5796_s0 = inlined_call_operand.hbm [shape: f32[16,32], index: 0, kind: input, shape index: {}]   ;;  %s5797_s1 = inlined_call_operand.hbm [shape: f32[16,32], index: 1, kind: input, shape index: {}]   ;;  %s5798_s2 = inlined_call_operand.vmem [shape: f32[2,32,96], index: 2, kind: input, shape index: {}]   ;;  %s5799_s3 = inlined_call_operand.vmem [shape: f32[2,1,96], index: 3, kind: input, shape index: {}]   ;;  %s5800_s4 = inlined_call_operand.vmem [shape: f32[2,32,32], index: 4, kind: input, shape index: {}]   ;;  %s5801_s5 = inlined_call_operand.vmem [shape: f32[2,1,32], index: 5, kind: input, shape index: {}]   ;;  %s5802_s6 = inlined_call_operand.vmem [shape: f32[2,32,64], index: 6, kind: input, shape index: {}]   ;;  %s5803_s7 = inlined_call_operand.vmem [shape: f32[2,1,64], index: 7, kind: input, shape index: {}]   ;;  %s5804_s8 = inlined_call_operand.vmem [shape: f32[2,64,32], index: 8, kind: input, shape index: {}]   ;;  %s5805_s9 = inlined_call_operand.vmem [shape: f32[2,1,32], index: 9, kind: input, shape index: {}]   ;;  %s5806_s10 = inlined_call_operand.vmem [shape: f32[2,1,32], index: 10, kind: input, shape index: {}]   ;;  %s5807_s11 = inlined_call_operand.vmem [shape: f32[2,1,32], index: 11, kind: input, shape index: {}]   ;;  %s5808_s12 = inlined_call_operand.vmem [shape: f32[2,1,32], index: 12, kind: input, shape index: {}]   ;;  %s5809_s13 = inlined_call_operand.vmem [shape: f32[2,1,32], index: 13, kind: input, shape index: {}]   ;;  %s5810_s14 = inlined_call_operand.hbm [shape: f32[32,128], index: 14, kind: input, shape index: {}]   ;;  %s5811_s15 = inlined_call_operand.vmem [shape: f32[1,128], index: 15, kind: input, shape index: {}]   ;;  %s5812_s16 = inlined_call_operand.hbm [shape: f32[16,128], index: 16, kind: output, shape index: {}]  }
   0x1   :  { %5819 = sst [smem:[#allocation12_spill]] %s5796_s0 }
   0x2   :  { %21 = vsyncpa [#allocation3], 0 }
   0x3   :  { %22 = vsyncpa [#allocation6], 0 }
   0x4   :  { %23 = vsyncpa [#allocation4], 0  ;;  %s5099_s21 = smov [#allocation5]   ;;  %s5100_s23 = smov [#allocation2]  }
   0x5   :  { %s41_s22 = sshll.u32 %s5099_s21, 4  ;;  %s29_s24 = sshll.u32 %s5100_s23, 4  ;;  %s42_s22 = int_to_ptr.vmem [resolvable:$true] %s41_s22  ;;  %s30_s24 = int_to_ptr.vmem [resolvable:$true] %s29_s24 }
   0x6   :  { %s5021_s25 = scalar_lea.vmem %s42_s22, 256  ;;  %p5026_p1 = scmp.lt.s32.totalorder %s42_s22, %s42_s22 }
   0x7   :  { %p5022_p0 = scmp.ne.s32.totalorder %s42_s22, %s5021_s25  ;;  %p5027_p2 = scmp.lt.s32.totalorder %s5021_s25, %s5021_s25 }
   0x9   :  { %p5028_p3 = por %p5027_p2, %p5026_p1 }
   0xb   :  { %p5029_p4 = pnand %p5028_p3, %p5022_p0 }
   0xd   :  { %5032 = shalt.err (!%p5029_p4)
}
   0xe   :  { %s5813_s26 = smov 128   ;;  %s5814_s27 = smov 8  }
   0xf   :  { %47 = dma.hbm_to_vmem [thread:$0]  %s5797_s1, 256, %s42_s22, [#allocation6], %s5813_s26, %s5813_s26, %s5814_s27  }
  0x10   :  { %s5041_s30 = scalar_lea.vmem %s30_s24, 256  ;;  %p5046_p6 = scmp.lt.s32.totalorder %s30_s24, %s30_s24 }
  0x11   :  { %p5042_p5 = scmp.ne.s32.totalorder %s30_s24, %s5041_s30  ;;  %p5047_p7 = scmp.lt.s32.totalorder %s5041_s30, %s5041_s30 }
  0x13   :  { %p5048_p8 = por %p5047_p7, %p5046_p6 }
  0x15   :  { %p5049_p9 = pnand %p5048_p8, %p5042_p5 }
  0x17   :  { %5052 = shalt.err (!%p5049_p9)
}
  0x18   :  { %s5820_s18 = sld [smem:[#allocation12_spill]]  ;;  %s5103_s19 = smov [#allocation7]  }
  0x19   :  { %s77_s20 = sshll.u32 %s5103_s19, 4  ;;  %s78_s20 = int_to_ptr.vmem [resolvable:$true] %s77_s20 }
  0x1a   :  { %s5061_s21 = scalar_lea.vmem %s78_s20, 512  ;;  %p5066_p11 = scmp.lt.s32.totalorder %s78_s20, %s78_s20 }
  0x1b   :  { %p5062_p10 = scmp.ne.s32.totalorder %s78_s20, %s5061_s21  ;;  %p5067_p12 = scmp.lt.s32.totalorder %s5061_s21, %s5061_s21 }
  0x1d   :  { %p5068_p13 = por %p5067_p12, %p5066_p11 }
  0x1e   :  { %35 = dma.hbm_to_vmem [thread:$0]  %s5820_s18, 256, %s30_s24, [#allocation3], %s5813_s26, %s5813_s26, %s5814_s27  }
  0x1f   :  { %p5069_p0 = pnand %p5068_p13, %p5062_p10 }
  0x21   :  { %5072 = shalt.err (!%p5069_p0)
}
  0x22   :  { %83 = dma.hbm_to_vmem [thread:$0]  %s5810_s14, 512, %s78_s20, [#allocation6], %s5813_s26, %s5813_s26, %s5814_s27  }
  0x23   :  { %5093 = dma.done.wait [#allocation3], 256  }
  0x24   :  { %5094 = vsyncadd [#allocation3], 4294967040 }
  0x25   :  { %5095 = dma.done.wait [#allocation6], 768  }
  0x26   :  { %5096 = vsyncadd [#allocation6], 4294966528  ;;  %v111_v0 = vld [vmem:[%s5798_s2 + $0x18] sm:$0xff]  ;;  %v110_v1 = vld [vmem:[%s5798_s2 + $0x10] sm:$0xff]  ;;  %vm123_vm0 = vcmask 261120   ;;  %v5104_v12 = vmov 0.0   ;;  %v103_v20 = vlaneseq }
  0x27   :  { %4613 = vmatprep.subr.mxu0 %v111_v0  ;;  %v95_v2 = vld [vmem:[#allocation2] sm:$0xff]  ;;  %v99_v3 = vld [vmem:[#allocation5] sm:$0xff]  ;;  %v109_v4 = vld [vmem:[%s5798_s2 + $0x8] sm:$0xff]  ;;  %4624 = vmatprep.subr.mxu1 %v5104_v12  ;;  %vm5105_vm1 = vmmov 0   ;;  %s5106_s19 = smov 96   ;;  %vm208_vm2 = vcmask 64512  }
  0x28   :  { %4614 = vmatpush3.msra.mxu0 %v111_v0  ;;  %v97_v5 = vmul.f32 5.656854, %v95_v2  ;;  %v96_v6 = vld [vmem:[#allocation2 + $0x8] sm:$0xff]  ;;  %v100_v7 = vld [vmem:[#allocation5 + $0x8] sm:$0xff]  ;;  %v108_v9 = vld [vmem:[%s5798_s2] sm:$0xff]  ;;  %4626 = vmatprep.mubr.msk.f32.mxu1 %vm5105_vm1, %v5104_v12  ;;  %v104_v21 = vshrl.u32 %v103_v20, 7 }
  0x29   :  { %4615 = vmatprep.subr.mxu0 %v110_v1  ;;  %v98_v8 = vmul.f32 5.656854, %v96_v6  ;;  %v4352_v14 = vld [vmem:[%s5799_s3] ss:$0 sm:$0xff]  ;;  %v106_v22 = vand.u32 127, %v103_v20  ;;  %s5107_s20 = smov 64  }
  0x2a   :  { %4616 = vmatpush3.msra.mxu0 %v110_v1  ;;  %v5233_v10 = vadd.f32 %v99_v3, %v97_v5  ;;  %s5108_s21 = smov 88   ;;  %s5109_s1 = smov 120   ;;  %vm2043_vm4 = vcmask 523264  }
  0x2b   :  { %4617 = vmatprep.subr.mxu0 %v109_v4  ;;  %v5235_v11 = vadd.f32 %v100_v7, %v98_v8  ;;  %vm5270_vm3 = vcmp.le.s32.totalorder %v106_v22, %v104_v21  ;;  %s5110_s22 = smov 56   ;;  %s5111_s23 = smov 112   ;;  %v112_v22 = vld [vmem:[%s5800_s4] sm:$0xff] }
  0x2c   :  { %4618 = vmatpush3.msra.mxu0 %v109_v4  ;;  %4621 = vmatprep.mubr.msk.f32.mxu0 %vm123_vm0, %v5233_v10  ;;  %s5112_s24 = smov 80   ;;  %s5113_s14 = smov 48  }
  0x2d   :  { %4619 = vmatprep.subr.mxu0 %v108_v9  ;;  %s5114_s0 = smov 72   ;;  %s5817_s17 = smov 104  }
  0x2e   :  { %4620 = vmatpush3.msra.mxu0 %v108_v9  ;;  %s5815_s28 = smov 40  }
  0x2f   :  { %4622 = vmatmul.mubr.msk.f32.vlgmr.msra.gmra.mxu0 %vm123_vm0, %v5235_v11  ;;  %4634 = vmatprep.subr.mxu0 %v5104_v12 }
  0x30   :  { %4636 = vmatprep.mubr.msk.f32.mxu0 %vm5105_vm1, %v5104_v12 }
  0xef   :  { %v4623_v13 = vpop.f32.mrf.mxu0 }
  0xf0   :  { %v5254_v17 = vadd.f32 %v4623_v13, %v4352_v14 }
  0xf1   :  { %v196_v15 = vpop.f32.mrf.mxu0 }
  0xf2   :  { %v5250_v16 = vadd.f32 %v4352_v14, %v196_v15 }
  0xf4   :  { %206 = vrot.lane.b32.xlu0 %v5250_v16, %s5106_s19 }
  0xf8   :  { %284 = vrot.lane.b32.xlu0 %v5254_v17, %s5106_s19 }
 0x166   :  { %v207_v18 = vpop.permute.xlu0 %206 }
 0x167   :  { %4625 = vmatpush3.xpose.msk.msra.mxu1 %vm208_vm2, %v207_v18 }
 0x168   :  { %4629 = vmatprep.subr.mxu1 %v5104_v12 }
 0x16a   :  { %4627 = vmatmul.mubr.msk.f32.vlgmr.msra.gmra.mxu1 %vm208_vm2, %v5250_v16  ;;  %v285_v19 = vpop.permute.xlu0 %284 }
 0x16b   :  { %4630 = vmatpush3.xpose.msk.msra.mxu1 %vm208_vm2, %v285_v19  ;;  %4631 = vmatprep.mubr.msk.f32.mxu1 %vm5105_vm1, %v5104_v12 }
 0x16c   :  { %4639 = vmatprep.subr.mxu1 %v5104_v12 }
 0x16e   :  { %4632 = vmatmul.mubr.msk.f32.vlgmr.msra.gmra.mxu1 %vm208_vm2, %v5254_v17 }
 0x16f   :  { %4641 = vmatprep.mubr.msk.f32.mxu1 %vm5105_vm1, %v5104_v12 }
 0x22a   :  { %v279_v23 = vpop.f32.mrf.mxu1 }
 0x22b   :  { %v360_v25 = vmul.f32 0.35355338, %v279_v23 }
 0x22c   :  { %v4628_v26 = vpop.f32.mrf.mxu1 }
 0x22d   :  { %v364_v27 = vsel %vm5270_vm3, %v360_v25, -1e+30 }
 0x22e   :  { %v356_v28 = vpop.f32.mrf.mxu1  ;;  %v366_v29 = vsel %vm208_vm2, %v364_v27, -inf }
 0x22f   :  { %v361_v30 = vmul.f32 0.35355338, %v356_v28  ;;  %367 = vmax.xlane.f32.xlu1 %v366_v29 }
 0x230   :  { %v4633_v31 = vpop.f32.mrf.mxu1 }
 0x231   :  { %v365_v32 = vsel %vm5270_vm3, %v361_v30, -1e+30 }
 0x232   :  { %v369_v33 = vsel %vm208_vm2, %v365_v32, -inf }
 0x233   :  { %370 = vmax.xlane.f32.xlu1 %v369_v33 }
 0x244   :  { %388 = vrot.lane.b32.xlu1 %v5250_v16, %s5107_s20 }
 0x248   :  { %464 = vrot.lane.b32.xlu1 %v5254_v17, %s5107_s20 }
 0x24c   :  { %542 = vrot.lane.b32.xlu1 %v5250_v16, %s5108_s21 }
 0x250   :  { %620 = vrot.lane.b32.xlu1 %v5254_v17, %s5108_s21 }
 0x2b8   :  { %v368_v34 = vpop.xlane.xlu1 %367 }
 0x2b9   :  { %v372_v35 = vsub.f32 %v364_v27, %v368_v34  ;;  %v113_v34 = vld [vmem:[%s5800_s4 + $0x8] sm:$0xff] }
 0x2bb   :  { %v374_v36 = vmul.f32 1.442695, %v372_v35 }
 0x2bc   :  { %v371_v37 = vpop.xlane.xlu1 %370 }
 0x2bd   :  { %4925 = vpow2.f32 %v374_v36  ;;  %v373_v38 = vsub.f32 %v365_v32, %v371_v37 }
 0x2bf   :  { %v376_v39 = vmul.f32 1.442695, %v373_v38 }
 0x2c0   :  { %v389_v40 = vpop.permute.xlu1 %388 }
 0x2c1   :  { %4927 = vpow2.f32 %v376_v39  ;;  %4635 = vmatpush3.msra.mxu0 %v389_v40 }
 0x2c2   :  { %4644 = vmatprep.subr.mxu0 %v5104_v12 }
 0x2c4   :  { %v465_v41 = vpop.permute.xlu1 %464 }
 0x2c5   :  { %4640 = vmatpush3.msra.mxu1 %v465_v41 }
 0x2c6   :  { %4649 = vmatprep.subr.mxu1 %v5104_v12 }
 0x2c8   :  { %v543_v46 = vpop.permute.xlu1 %542 }
 0x2ca   :  { %v4926_v42 = vpop.eup %4925 }
 0x2cb   :  { %v378_v43 = vsel %vm208_vm2, %v4926_v42, 0.0 }
 0x2cc   :  { %379 = vadd.xlane.f32.xlu0 %v378_v43  ;;  %v621_v47 = vpop.permute.xlu1 %620 }
 0x2ce   :  { %v4928_v44 = vpop.eup %4927 }
 0x2cf   :  { %v381_v45 = vsel %vm208_vm2, %v4928_v44, 0.0 }
 0x2d0   :  { %382 = vadd.xlane.f32.xlu1 %v381_v45 }
 0x2e1   :  { %618 = vrot.lane.b32.xlu1 %v5254_v17, %s5109_s1 }
 0x2e2   :  { %540 = vrot.lane.b32.xlu0 %v5250_v16, %s5109_s1 }
 0x355   :  { %v380_v48 = vpop.xlane.xlu0 %379 }
 0x356   :  { %4929 = vrcp.f32 %v380_v48 }
 0x359   :  { %v383_v49 = vpop.xlane.xlu1 %382  ;;  %v541_v54 = vpop.permute.xlu0 %540 }
 0x35a   :  { %4931 = vrcp.f32 %v383_v49 }
 0x35d   :  { %v619_v55 = vpop.permute.xlu1 %618 }
 0x363   :  { %v4930_v50 = vpop.eup %4929 }
 0x364   :  { %v385_v51 = vmul.f32 %v4930_v50, %v4926_v42 }
 0x366   :  { %4637 = vmatmul.mubr.msk.f32.vlgmr.msra.gmra.mxu0 %vm208_vm2, %v385_v51 }
 0x367   :  { %v4932_v52 = vpop.eup %4931  ;;  %4645 = vmatpush3.xpose.msk.msra.mxu0 %vm208_vm2, %v543_v46  ;;  %4646 = vmatprep.mubr.msk.f32.mxu0 %vm5105_vm1, %v5104_v12 }
 0x368   :  { %v387_v53 = vmul.f32 %v4932_v52, %v4928_v44  ;;  %4654 = vmatprep.subr.mxu0 %v5104_v12 }
 0x36a   :  { %4642 = vmatmul.mubr.msk.f32.vlgmr.msra.gmra.mxu1 %vm208_vm2, %v387_v53  ;;  %4647 = vmatmul.mubr.msk.f32.vlgmr.msra.gmra.mxu0 %vm208_vm2, %v541_v54 }
 0x36b   :  { %4650 = vmatpush3.xpose.msk.msra.mxu1 %vm208_vm2, %v621_v47  ;;  %4651 = vmatprep.mubr.msk.f32.mxu1 %vm5105_vm1, %v5104_v12 }
 0x36c   :  { %4659 = vmatprep.subr.mxu1 %v5104_v12  ;;  %4656 = vmatprep.mubr.msk.f32.mxu0 %vm5105_vm1, %v5104_v12 }
 0x36e   :  { %4652 = vmatmul.mubr.msk.f32.vlgmr.msra.gmra.mxu1 %vm208_vm2, %v619_v55 }
 0x36f   :  { %4661 = vmatprep.mubr.msk.f32.mxu1 %vm5105_vm1, %v5104_v12 }
 0x426   :  { %v460_v56 = vpop.f32.mrf.mxu0 }
 0x428   :  { %v4638_v57 = vpop.f32.mrf.mxu0 }
 0x42a   :  { %v536_v58 = vpop.f32.mrf.mxu1  ;;  %v614_v59 = vpop.f32.mrf.mxu0 }
 0x42b   :  { %v696_v60 = vmul.f32 0.35355338, %v614_v59 }
 0x42c   :  { %v4643_v61 = vpop.f32.mrf.mxu1  ;;  %v4648_v62 = vpop.f32.mrf.mxu0 }
 0x42d   :  { %v698_v63 = vsel %vm5270_vm3, %v696_v60, -1e+30 }
 0x42e   :  { %v692_v0 = vpop.f32.mrf.mxu1  ;;  %v700_v1 = vsel %vm208_vm2, %v698_v63, -inf }
 0x42f   :  { %v697_v2 = vmul.f32 0.35355338, %v692_v0  ;;  %701 = vmax.xlane.f32.xlu1 %v700_v1 }
 0x430   :  { %v4653_v3 = vpop.f32.mrf.mxu1 }
 0x431   :  { %v699_v4 = vsel %vm5270_vm3, %v697_v2, -1e+30 }
 0x432   :  { %v703_v5 = vsel %vm208_vm2, %v699_v4, -inf }
 0x433   :  { %704 = vmax.xlane.f32.xlu0 %v703_v5 }
 0x449   :  { %798 = vrot.lane.b32.xlu0 %v5254_v17, %s5110_s22 }
 0x44d   :  { %1036 = vrot.lane.b32.xlu0 %v5250_v16, %s5111_s23 }
 0x4b8   :  { %v702_v6 = vpop.xlane.xlu1 %701 }
 0x4b9   :  { %v706_v7 = vsub.f32 %v698_v63, %v702_v6 }
 0x4bb   :  { %v708_v8 = vmul.f32 1.442695, %v706_v7 }
 0x4bc   :  { %v705_v9 = vpop.xlane.xlu0 %704 }
 0x4bd   :  { %4933 = vpow2.f32 %v708_v8  ;;  %v707_v13 = vsub.f32 %v699_v4, %v705_v9 }
 0x4bf   :  { %v710_v14 = vmul.f32 1.442695, %v707_v13  ;;  %v114_v13 = vld [vmem:[%s5800_s4 + $0x10] sm:$0xff] }
 0x4c0   :  { %v799_v15 = vpop.permute.xlu0 %798 }
 0x4c1   :  { %4935 = vpow2.f32 %v710_v14  ;;  %4660 = vmatpush3.msra.mxu1 %v799_v15 }
 0x4c2   :  { %4669 = vmatprep.subr.mxu1 %v112_v22 }
 0x4c4   :  { %v1037_v39 = vpop.permute.xlu0 %1036 }
 0x4ca   :  { %v4934_v18 = vpop.eup %4933 }
 0x4cb   :  { %v712_v19 = vsel %vm208_vm2, %v4934_v18, 0.0 }
 0x4cc   :  { %713 = vadd.xlane.f32.xlu1 %v712_v19 }
 0x4ce   :  { %v4936_v20 = vpop.eup %4935 }
 0x4cf   :  { %v715_v21 = vsel %vm208_vm2, %v4936_v20, 0.0 }
 0x4d0   :  { %716 = vadd.xlane.f32.xlu1 %v715_v21 }
 0x4e1   :  { %722 = vrot.lane.b32.xlu1 %v5250_v16, %s5110_s22 }
 0x4e5   :  { %1038 = vrot.lane.b32.xlu1 %v5250_v16, %s5112_s24 }
 0x4e9   :  { %1116 = vrot.lane.b32.xlu1 %v5254_v17, %s5112_s24 }
 0x4ed   :  { %1114 = vrot.lane.b32.xlu1 %v5254_v17, %s5111_s23 }
 0x555   :  { %v714_v23 = vpop.xlane.xlu1 %713 }
 0x556   :  { %4937 = vrcp.f32 %v714_v23 }
 0x559   :  { %v717_v25 = vpop.xlane.xlu1 %716 }
 0x55a   :  { %4939 = vrcp.f32 %v717_v25 }
 0x55d   :  { %v723_v26 = vpop.permute.xlu1 %722 }
 0x55e   :  { %4655 = vmatpush3.msra.mxu0 %v723_v26 }
 0x55f   :  { %4664 = vmatprep.subr.mxu0 %v113_v34 }
 0x561   :  { %v1039_v29 = vpop.permute.xlu1 %1038 }
 0x563   :  { %v4938_v27 = vpop.eup %4937 }
 0x564   :  { %v719_v28 = vmul.f32 %v4938_v27, %v4934_v18 }
 0x565   :  { %v1117_v32 = vpop.permute.xlu1 %1116 }
 0x566   :  { %4657 = vmatmul.mubr.msk.f32.vlgmr.msra.gmra.mxu0 %vm208_vm2, %v719_v28 }
 0x567   :  { %v4940_v30 = vpop.eup %4939  ;;  %4665 = vmatpush3.msra.mxu0 %v113_v34 }
 0x568   :  { %v721_v31 = vmul.f32 %v4940_v30, %v4936_v20  ;;  %4674 = vmatprep.subr.mxu0 %v5104_v12 }
 0x569   :  { %v1115_v33 = vpop.permute.xlu1 %1114 }
 0x56a   :  { %4662 = vmatmul.mubr.msk.f32.vlgmr.msra.gmra.mxu1 %vm208_vm2, %v721_v31 }
 0x56b   :  { %4671 = vmatprep.mubr.msk.f32.mxu1 %vm208_vm2, %v460_v56  ;;  %4670 = vmatpush3.msra.mxu1 %v112_v22 }
 0x56c   :  { %4679 = vmatprep.subr.mxu1 %v5104_v12 }
 0x56e   :  { %4672 = vmatmul.mubr.msk.f32.vlgmr.msra.gmra.mxu1 %vm208_vm2, %v536_v58 }
 0x56f   :  { %4680 = vmatpush3.xpose.msk.msra.mxu1 %vm208_vm2, %v1117_v32  ;;  %4681 = vmatprep.mubr.msk.f32.mxu1 %vm5105_vm1, %v5104_v12 }
 0x570   :  { %4689 = vmatprep.subr.mxu1 %v5104_v12 }
 0x572   :  { %4682 = vmatmul.mubr.msk.f32.vlgmr.msra.gmra.mxu1 %vm208_vm2, %v1115_v33 }
 0x573   :  { %4691 = vmatprep.mubr.msk.f32.mxu1 %vm5105_vm1, %v5104_v12 }
 0x626   :  { %v794_v35 = vpop.f32.mrf.mxu0 }
 0x627   :  { %4666 = vmatprep.mubr.msk.f32.mxu0 %vm208_vm2, %v794_v35 }
 0x628   :  { %v4658_v36 = vpop.f32.mrf.mxu0 }
 0x62a   :  { %v870_v37 = vpop.f32.mrf.mxu1 }
 0x62b   :  { %4667 = vmatmul.mubr.msk.f32.vlgmr.msra.gmra.mxu0 %vm208_vm2, %v870_v37 }
 0x62c   :  { %4675 = vmatpush3.xpose.msk.msra.mxu0 %vm208_vm2, %v1039_v29  ;;  %v4663_v38 = vpop.f32.mrf.mxu1  ;;  %4676 = vmatprep.mubr.msk.f32.mxu0 %vm5105_vm1, %v5104_v12 }
 0x62d   :  { %4684 = vmatprep.subr.mxu0 %v5104_v12 }
 0x62e   :  { %v5357_v40 = vpop.f32.mrf.mxu1 }
 0x62f   :  { %4677 = vmatmul.mubr.msk.f32.vlgmr.msra.gmra.mxu0 %vm208_vm2, %v1037_v39 }
 0x630   :  { %v5360_v41 = vpop.f32.mrf.mxu1  ;;  %4686 = vmatprep.mubr.msk.f32.mxu0 %vm5105_vm1, %v5104_v12 }
 0x632   :  { %v1188_v42 = vpop.f32.mrf.mxu1 }
 0x633   :  { %v1193_v43 = vmul.f32 0.35355338, %v1188_v42 }
 0x634   :  { %v4683_v44 = vpop.f32.mrf.mxu1 }
 0x635   :  { %v1195_v45 = vsel %vm5270_vm3, %v1193_v43, -1e+30 }
 0x636   :  { %v1199_v46 = vsel %vm208_vm2, %v1195_v45, -inf }
 0x637   :  { %1200 = vmax.xlane.f32.xlu1 %v1199_v46 }
 0x648   :  { %1218 = vrot.lane.b32.xlu1 %v5250_v16, %s5113_s14 }
 0x64c   :  { %1455 = vrot.lane.b32.xlu1 %v5250_v16, %s5114_s0 }
 0x650   :  { %1533 = vrot.lane.b32.xlu1 %v5254_v17, %s5114_s0 }
 0x654   :  { %1531 = vrot.lane.b32.xlu1 %v5254_v17, %s5817_s17 }
 0x6c0   :  { %v1201_v47 = vpop.xlane.xlu1 %1200 }
 0x6c1   :  { %v1203_v49 = vsub.f32 %v1195_v45, %v1201_v47 }
 0x6c3   :  { %v1206_v50 = vmul.f32 1.442695, %v1203_v49 }
 0x6c4   :  { %v1219_v48 = vpop.permute.xlu1 %1218 }
 0x6c5   :  { %4685 = vmatpush3.msra.mxu0 %v1219_v48  ;;  %4941 = vpow2.f32 %v1206_v50 }
 0x6c6   :  { %4694 = vmatprep.subr.mxu0 %v114_v13 }
 0x6c8   :  { %v1456_v6 = vpop.permute.xlu1 %1455 }
 0x6cc   :  { %v1534_v23 = vpop.permute.xlu1 %1533 }
 0x6d0   :  { %v1532_v27 = vpop.permute.xlu1 %1531 }
 0x6d2   :  { %v4942_v58 = vpop.eup %4941 }
 0x6d3   :  { %v1211_v59 = vsel %vm208_vm2, %v4942_v58, 0.0 }
 0x6eb   :  { %v5375_v51 = vpop.f32.mrf.mxu0 }
 0x6ec   :  { %v1033_v33 = vadd.f32 %v5357_v40, %v5375_v51 }
 0x6ed   :  { %v5377_v52 = vpop.f32.mrf.mxu0 }
 0x6ee   :  { %v1028_v35 = vadd.f32 %v5360_v41, %v5377_v52 }
 0x6ef   :  { %v1110_v53 = vpop.f32.mrf.mxu0 }
 0x6f0   :  { %v1192_v54 = vmul.f32 0.35355338, %v1110_v53 }
 0x6f1   :  { %v4678_v55 = vpop.f32.mrf.mxu0 }
 0x6f2   :  { %v1194_v56 = vsel %vm5270_vm3, %v1192_v54, -1e+30 }
 0x6f3   :  { %v1196_v57 = vsel %vm208_vm2, %v1194_v56, -inf }
 0x6f4   :  { %1197 = vmax.xlane.f32.xlu0 %v1196_v57 }
 0x6f8   :  { %1212 = vadd.xlane.f32.xlu0 %v1211_v59 }
 0x77d   :  { %v1198_v60 = vpop.xlane.xlu0 %1197 }
 0x77e   :  { %v1202_v61 = vsub.f32 %v1194_v56, %v1198_v60 }
 0x780   :  { %v1204_v62 = vmul.f32 1.442695, %v1202_v61  ;;  %v4387_v61 = vld [vmem:[%s5801_s5] ss:$0 sm:$0xff] }
 0x781   :  { %v1213_v1 = vpop.xlane.xlu0 %1212 }
 0x782   :  { %4943 = vpow2.f32 %v1204_v62 }
 0x783   :  { %4945 = vrcp.f32 %v1213_v1 }
 0x78f   :  { %v4944_v63 = vpop.eup %4943 }
 0x790   :  { %v1208_v0 = vsel %vm208_vm2, %v4944_v63, 0.0  ;;  %v4946_v3 = vpop.eup %4945 }
 0x791   :  { %1209 = vadd.xlane.f32.xlu0 %v1208_v0  ;;  %v1217_v5 = vmul.f32 %v4946_v3, %v4942_v58 }
 0x7a7   :  { %1294 = vrot.lane.b32.xlu0 %v5254_v17, %s5113_s14 }
 0x7ab   :  { %1453 = vrot.lane.b32.xlu0 %v5250_v16, %s5817_s17 }
 0x81a   :  { %v1210_v2 = vpop.xlane.xlu0 %1209 }
 0x81b   :  { %4947 = vrcp.f32 %v1210_v2 }
 0x81e   :  { %v1295_v4 = vpop.permute.xlu0 %1294 }
 0x81f   :  { %4690 = vmatpush3.msra.mxu1 %v1295_v4 }
 0x820   :  { %4692 = vmatmul.mubr.msk.f32.vlgmr.msra.gmra.mxu1 %vm208_vm2, %v1217_v5  ;;  %4699 = vmatprep.subr.mxu1 %v5104_v12 }
 0x821   :  { %4700 = vmatpush3.xpose.msk.msra.mxu1 %vm208_vm2, %v1456_v6  ;;  %4701 = vmatprep.mubr.msk.f32.mxu1 %vm5105_vm1, %v5104_v12 }
 0x822   :  { %v1454_v7 = vpop.permute.xlu0 %1453  ;;  %4709 = vmatprep.subr.mxu1 %v5104_v12 }
 0x824   :  { %4702 = vmatmul.mubr.msk.f32.vlgmr.msra.gmra.mxu1 %vm208_vm2, %v1454_v7 }
 0x825   :  { %4711 = vmatprep.mubr.msk.f32.mxu1 %vm5105_vm1, %v5104_v12 }
 0x828   :  { %v4948_v8 = vpop.eup %4947 }
 0x829   :  { %v1215_v9 = vmul.f32 %v4948_v8, %v4944_v63 }
 0x82b   :  { %4687 = vmatmul.mubr.msk.f32.vlgmr.msra.gmra.mxu0 %vm208_vm2, %v1215_v9 }
 0x82c   :  { %4695 = vmatpush3.msra.mxu0 %v114_v13 }
 0x82d   :  { %4704 = vmatprep.subr.mxu0 %v5104_v12 }
 0x8e0   :  { %v1366_v14 = vpop.f32.mrf.mxu1 }
 0x8e2   :  { %v4693_v15 = vpop.f32.mrf.mxu1 }
 0x8e4   :  { %v1527_v18 = vpop.f32.mrf.mxu1 }
 0x8e5   :  { %v1609_v19 = vmul.f32 0.35355338, %v1527_v18 }
 0x8e6   :  { %v4703_v20 = vpop.f32.mrf.mxu1 }
 0x8e7   :  { %v1611_v21 = vsel %vm5270_vm3, %v1609_v19, -1e+30 }
 0x8e8   :  { %v1613_v22 = vsel %vm208_vm2, %v1611_v21, -inf }
 0x8e9   :  { %1614 = vmax.xlane.f32.xlu0 %v1613_v22  ;;  %v1927_v22 = vld [vmem:[%s5802_s6 + $0x8] sm:$0xff] }
 0x8eb   :  { %v1290_v25 = vpop.f32.mrf.mxu0 }
 0x8ec   :  { %4696 = vmatprep.mubr.msk.f32.mxu0 %vm208_vm2, %v1290_v25 }
 0x8ed   :  { %v4688_v26 = vpop.f32.mrf.mxu0  ;;  %4697 = vmatmul.mubr.msk.f32.vlgmr.msra.gmra.mxu0 %vm208_vm2, %v1366_v14 }
 0x8ee   :  { %4705 = vmatpush3.xpose.msk.msra.mxu0 %vm208_vm2, %v1534_v23  ;;  %4706 = vmatprep.mubr.msk.f32.mxu0 %vm5105_vm1, %v5104_v12  ;;  %v1926_v23 = vld [vmem:[%s5802_s6] sm:$0xff] }
 0x8ef   :  { %4714 = vmatprep.subr.mxu0 %v5104_v12 }
 0x8f1   :  { %4707 = vmatmul.mubr.msk.f32.vlgmr.msra.gmra.mxu0 %vm208_vm2, %v1532_v27 }
 0x8f2   :  { %4716 = vmatprep.mubr.msk.f32.mxu0 %vm5105_vm1, %v5104_v12 }
 0x972   :  { %v1615_v28 = vpop.xlane.xlu0 %1614 }
 0x973   :  { %v1619_v29 = vsub.f32 %v1611_v21, %v1615_v28  ;;  %v1928_v21 = vld [vmem:[%s5802_s6 + $0x10] sm:$0xff] }
 0x975   :  { %v1621_v30 = vmul.f32 1.442695, %v1619_v29 }
 0x977   :  { %4949 = vpow2.f32 %v1621_v30 }
 0x984   :  { %v4950_v31 = vpop.eup %4949 }
 0x985   :  { %v1625_v32 = vsel %vm208_vm2, %v4950_v31, 0.0 }
 0x986   :  { %1626 = vadd.xlane.f32.xlu0 %v1625_v32  ;;  %v4388_v32 = vld [vmem:[%s5806_s10] ss:$0 sm:$0xff] }
 0x9ad   :  { %v4698_v34 = vpop.f32.mrf.mxu0 }
 0x9ae   :  { %v1452_v36 = vadd.f32 %v4698_v34, %v1033_v33 }
 0x9af   :  { %v1442_v37 = vpop.f32.mrf.mxu0 }
 0x9b0   :  { %v1451_v38 = vadd.f32 %v1442_v37, %v1028_v35  ;;  %v4389_v37 = vld [vmem:[%s5807_s11] ss:$0 sm:$0xff] }
 0x9b1   :  { %v1605_v39 = vpop.f32.mrf.mxu0 }
 0x9b2   :  { %v1610_v42 = vmul.f32 0.35355338, %v1605_v39 }
 0x9b3   :  { %v4708_v43 = vpop.f32.mrf.mxu0 }
 0x9b4   :  { %v1612_v44 = vsel %vm5270_vm3, %v1610_v42, -1e+30  ;;  %v2035_v43 = vld [vmem:[%s5804_s8 + $0x38] sm:$0xff] }
 0x9b5   :  { %v1616_v45 = vsel %vm208_vm2, %v1612_v44, -inf }
 0x9b6   :  { %1617 = vmax.xlane.f32.xlu1 %v1616_v45  ;;  %v2033_v45 = vld [vmem:[%s5804_s8 + $0x28] sm:$0xff] }
 0x9c7   :  { %1635 = vrot.lane.b32.xlu1 %v5250_v16, %s5815_s28  ;;  %v115_v16 = vld [vmem:[%s5800_s4 + $0x18] sm:$0xff] }
 0xa0f   :  { %v1627_v40 = vpop.xlane.xlu0 %1626 }
 0xa10   :  { %4951 = vrcp.f32 %v1627_v40  ;;  %v2032_v40 = vld [vmem:[%s5804_s8 + $0x20] sm:$0xff] }
 0xa1d   :  { %v4952_v41 = vpop.eup %4951 }
 0xa1e   :  { %v1632_v50 = vmul.f32 %v4952_v41, %v4950_v31  ;;  %v2030_v41 = vld [vmem:[%s5804_s8 + $0x10] sm:$0xff] }
 0xa3f   :  { %v1618_v46 = vpop.xlane.xlu1 %1617 }
 0xa40   :  { %v1620_v47 = vsub.f32 %v1612_v44, %v1618_v46  ;;  %v2034_v44 = vld [vmem:[%s5804_s8 + $0x30] sm:$0xff]  ;;  %v2031_v46 = vld [vmem:[%s5804_s8 + $0x18] sm:$0xff] }
 0xa42   :  { %v1623_v48 = vmul.f32 1.442695, %v1620_v47  ;;  %v2029_v47 = vld [vmem:[%s5804_s8 + $0x8] sm:$0xff] }
 0xa43   :  { %v1636_v49 = vpop.permute.xlu1 %1635 }
 0xa44   :  { %4953 = vpow2.f32 %v1623_v48  ;;  %4710 = vmatpush3.msra.mxu1 %v1636_v49  ;;  %v2028_v48 = vld [vmem:[%s5804_s8] sm:$0xff] }
 0xa45   :  { %4712 = vmatmul.mubr.msk.f32.vlgmr.msra.gmra.mxu1 %vm208_vm2, %v1632_v50  ;;  %4719 = vmatprep.subr.mxu1 %v115_v16  ;;  %v4390_v49 = vld [vmem:[%s5803_s7] ss:$0 sm:$0xff] }
 0xa46   :  { %4720 = vmatpush3.msra.mxu1 %v115_v16 }
 0xa47   :  { %4735 = vmatprep.subr.mxu1 %v2035_v43 }
 0xa51   :  { %v4954_v51 = vpop.eup %4953 }
 0xa52   :  { %v1628_v52 = vsel %vm208_vm2, %v4954_v51, 0.0 }
 0xa53   :  { %1629 = vadd.xlane.f32.xlu0 %v1628_v52 }
 0xa69   :  { %1711 = vrot.lane.b32.xlu0 %v5254_v17, %s5815_s28 }
 0xadc   :  { %v1630_v53 = vpop.xlane.xlu0 %1629 }
 0xadd   :  { %4955 = vrcp.f32 %v1630_v53 }
 0xae0   :  { %v1712_v54 = vpop.permute.xlu0 %1711 }
 0xae1   :  { %4715 = vmatpush3.msra.mxu0 %v1712_v54 }
 0xaea   :  { %v4956_v55 = vpop.eup %4955 }
 0xaeb   :  { %v1634_v56 = vmul.f32 %v4956_v55, %v4954_v51 }
 0xaed   :  { %4717 = vmatmul.mubr.msk.f32.vlgmr.msra.gmra.mxu0 %vm208_vm2, %v1634_v56 }
 0xb05   :  { %v1707_v57 = vpop.f32.mrf.mxu1 }
 0xb06   :  { %4721 = vmatprep.mubr.msk.f32.mxu1 %vm208_vm2, %v1707_v57 }
 0xb07   :  { %v4713_v58 = vpop.f32.mrf.mxu1 }
 0xbad   :  { %v1783_v59 = vpop.f32.mrf.mxu0 }
 0xbae   :  { %4722 = vmatmul.mubr.msk.f32.vlgmr.msra.gmra.mxu1 %vm208_vm2, %v1783_v59 }
 0xbaf   :  { %v4718_v17 = vpop.f32.mrf.mxu0  ;;  %4736 = vmatpush3.msra.mxu1 %v2035_v43  ;;  %v4407_v43 = vld [vmem:[%s5799_s3 + $0x1] ss:$0 sm:$0xff] }
 0xbb0   :  { %4737 = vmatprep.subr.mxu1 %v2034_v44 }
 0xbb1   :  { %4738 = vmatpush3.msra.mxu1 %v2034_v44 }
 0xbb2   :  { %4739 = vmatprep.subr.mxu1 %v2033_v45 }
 0xbb3   :  { %4740 = vmatpush3.msra.mxu1 %v2033_v45 }
 0xbb4   :  { %4741 = vmatprep.subr.mxu1 %v2032_v40 }
 0xbb5   :  { %4742 = vmatpush3.msra.mxu1 %v2032_v40 }
 0xbb6   :  { %4743 = vmatprep.subr.mxu1 %v2031_v46 }
 0xbb7   :  { %4744 = vmatpush3.msra.mxu1 %v2031_v46 }
 0xbb8   :  { %4745 = vmatprep.subr.mxu1 %v2030_v41 }
 0xbb9   :  { %4746 = vmatpush3.msra.mxu1 %v2030_v41 }
 0xbba   :  { %4747 = vmatprep.subr.mxu1 %v2029_v47 }
 0xbbb   :  { %4748 = vmatpush3.msra.mxu1 %v2029_v47 }
 0xbbc   :  { %4749 = vmatprep.subr.mxu1 %v2028_v48 }
 0xbbd   :  { %4750 = vmatpush3.msra.mxu1 %v2028_v48 }
 0xbbe   :  { %4770 = vmatprep.subr.mxu1 %v5104_v12 }
 0xc6e   :  { %v4723_v60 = vpop.f32.mrf.mxu1 }
 0xc6f   :  { %v1869_v62 = vadd.f32 %v4723_v60, %v1452_v36 }
 0xc70   :  { %v1859_v63 = vpop.f32.mrf.mxu1 }
 0xc71   :  { %v1878_v0 = vadd.f32 %v4387_v61, %v1869_v62  ;;  %v1868_v1 = vadd.f32 %v1859_v63, %v1451_v38  ;;  %v4393_v62 = vld [vmem:[%s5805_s9] ss:$0 sm:$0xff] }
 0xc73   :  { %v1877_v2 = vadd.f32 %v4387_v61, %v1868_v1  ;;  %v1880_v3 = vadd.f32 %v1878_v0, %v5235_v11 }
 0xc75   :  { %v1886_v4 = vsel %vm123_vm0, %v1880_v3, 0.0  ;;  %v1879_v5 = vadd.f32 %v1877_v2, %v5233_v10  ;;  %v1929_v10 = vld [vmem:[%s5802_s6 + $0x18] sm:$0xff] }
 0xc76   :  { %1887 = vadd.xlane.f32.xlu0 %v1886_v4  ;;  %4724 = vmatprep.subr.mxu0 %v1929_v10 }
 0xc77   :  { %v1883_v6 = vsel %vm123_vm0, %v1879_v5, 0.0  ;;  %4725 = vmatpush3.msra.mxu0 %v1929_v10  ;;  %v4401_v10 = vld [vmem:[%s5798_s2 + $0x38] sm:$0xff] }
 0xc78   :  { %1884 = vadd.xlane.f32.xlu1 %v1883_v6  ;;  %4726 = vmatprep.subr.mxu0 %v1928_v21 }
 0xc79   :  { %4727 = vmatpush3.msra.mxu0 %v1928_v21  ;;  %v4400_v21 = vld [vmem:[%s5798_s2 + $0x30] sm:$0xff] }
 0xc7a   :  { %4728 = vmatprep.subr.mxu0 %v1927_v22 }
 0xc7b   :  { %4729 = vmatpush3.msra.mxu0 %v1927_v22  ;;  %v4399_v22 = vld [vmem:[%s5798_s2 + $0x28] sm:$0xff] }
 0xc7c   :  { %4730 = vmatprep.subr.mxu0 %v1926_v23 }
 0xc7d   :  { %4731 = vmatpush3.msra.mxu0 %v1926_v23  ;;  %v4398_v23 = vld [vmem:[%s5798_s2 + $0x20] sm:$0xff] }
 0xc7e   :  { %4754 = vmatprep.subr.mxu0 %v4401_v10 }
 0xcff   :  { %v1888_v7 = vpop.xlane.xlu0 %1887 }
 0xd00   :  { %v1891_v8 = vmul.f32 0.03125, %v1888_v7 }
 0xd01   :  { %v1885_v9 = vpop.xlane.xlu1 %1884 }
 0xd02   :  { %v1893_v13 = vsub.f32 %v1880_v3, %v1891_v8  ;;  %v1890_v14 = vmul.f32 0.03125, %v1885_v9 }
 0xd04   :  { %v1892_v15 = vsub.f32 %v1879_v5, %v1890_v14  ;;  %v1895_v18 = vmul.f32 %v1893_v13, %v1893_v13 }
 0xd06   :  { %v1899_v19 = vsel %vm123_vm0, %v1895_v18, 0.0  ;;  %v1894_v20 = vmul.f32 %v1892_v15, %v1892_v15 }
 0xd07   :  { %1900 = vadd.xlane.f32.xlu0 %v1899_v19 }
 0xd08   :  { %v1896_v11 = vsel %vm123_vm0, %v1894_v20, 0.0 }
 0xd09   :  { %1897 = vadd.xlane.f32.xlu1 %v1896_v11 }
 0xd90   :  { %v1901_v25 = vpop.xlane.xlu0 %1900 }
 0xd91   :  { %v1903_v26 = vmul.f32 0.03125, %v1901_v25 }
 0xd92   :  { %v1898_v27 = vpop.xlane.xlu1 %1897 }
 0xd93   :  { %v1905_v28 = vadd.f32 1e-05, %v1903_v26  ;;  %v1902_v29 = vmul.f32 0.03125, %v1898_v27 }
 0xd95   :  { %4957 = vrsqrt.f32 %v1905_v28  ;;  %v1904_v30 = vadd.f32 1e-05, %v1902_v29 }
 0xd97   :  { %4959 = vrsqrt.f32 %v1904_v30 }
 0xda2   :  { %v4958_v31 = vpop.eup %4957 }
 0xda3   :  { %v1909_v33 = vmul.f32 %v4958_v31, %v1893_v13 }
 0xda4   :  { %v4960_v34 = vpop.eup %4959 }
 0xda5   :  { %v1908_v35 = vmul.f32 %v4960_v34, %v1892_v15  ;;  %v1917_v36 = vmul.f32 %v4388_v32, %v1909_v33 }
 0xda7   :  { %v1916_v38 = vmul.f32 %v4388_v32, %v1908_v35  ;;  %v1925_v42 = vadd.f32 %v4389_v37, %v1917_v36  ;;  %v4396_v32 = vld [vmem:[%s5808_s12] ss:$0 sm:$0xff] }
 0xda9   :  { %v1924_v39 = vadd.f32 %v4389_v37, %v1916_v38  ;;  %v4397_v37 = vld [vmem:[%s5809_s13] ss:$0 sm:$0xff] }
 0xdab   :  { %4732 = vmatprep.mubr.msk.f32.mxu0 %vm123_vm0, %v1924_v39 }
 0xdac   :  { %4733 = vmatmul.mubr.msk.f32.vlgmr.msra.gmra.mxu0 %vm123_vm0, %v1925_v42 }
 0xdad   :  { %4755 = vmatpush3.msra.mxu0 %v4401_v10 }
 0xdae   :  { %4756 = vmatprep.subr.mxu0 %v4400_v21 }
 0xdaf   :  { %4757 = vmatpush3.msra.mxu0 %v4400_v21 }
 0xdb0   :  { %4758 = vmatprep.subr.mxu0 %v4399_v22 }
 0xdb1   :  { %4759 = vmatpush3.msra.mxu0 %v4399_v22 }
 0xdb2   :  { %4760 = vmatprep.subr.mxu0 %v4398_v23 }
 0xdb3   :  { %4761 = vmatpush3.msra.mxu0 %v4398_v23 }
 0xdb4   :  { %4765 = vmatprep.subr.mxu0 %v5104_v12 }
 0xe6c   :  { %v4734_v50 = vpop.f32.mrf.mxu0 }
 0xe6d   :  { %v2015_v51 = vadd.f32 %v4734_v50, %v4390_v49 }
 0xe6e   :  { %v2009_v52 = vpop.f32.mrf.mxu0 }
 0xe6f   :  { %v2021_v16 = vmul.f32 0.70710677, %v2015_v51  ;;  %v2010_v53 = vadd.f32 %v4390_v49, %v2009_v52  ;;  %v2019_v17 = vmul.f32 0.5, %v2015_v51 }
 0xe71   :  { %4961 = verf.f32 %v2021_v16  ;;  %v2020_v54 = vmul.f32 0.70710677, %v2010_v53  ;;  %v2018_v58 = vmul.f32 0.5, %v2010_v53 }
 0xe73   :  { %4963 = verf.f32 %v2020_v54 }
 0xe7e   :  { %v4962_v55 = vpop.eup %4961 }
 0xe7f   :  { %v2025_v57 = vadd.f32 1.0, %v4962_v55 }
 0xe80   :  { %v4964_v56 = vpop.eup %4963 }
 0xe81   :  { %v2024_v59 = vadd.f32 1.0, %v4964_v56  ;;  %v2027_v61 = vmul.f32 %v2025_v57, %v2019_v17 }
 0xe83   :  { %v2026_v60 = vmul.f32 %v2024_v59, %v2018_v58 }
 0xe85   :  { %4751 = vmatprep.mubr.msk.f32.mxu1 %vm2043_vm4, %v2026_v60 }
 0xe86   :  { %4752 = vmatmul.mubr.msk.f32.vlgmr.msra.gmra.mxu1 %vm2043_vm4, %v2027_v61 }
 0xe87   :  { %4772 = vmatprep.mubr.msk.f32.mxu1 %vm5105_vm1, %v5104_v12 }
 0xf46   :  { %v4753_v63 = vpop.f32.mrf.mxu1 }
 0xf47   :  { %v2122_v0 = vadd.f32 %v4753_v63, %v4393_v62 }
 0xf48   :  { %v2116_v1 = vpop.f32.mrf.mxu1 }
 0xf49   :  { %v2117_v2 = vadd.f32 %v4393_v62, %v2116_v1  ;;  %v2126_v3 = vadd.f32 %v2122_v0, %v1925_v42 }
 0xf4b   :  { %v2132_v4 = vsel %vm123_vm0, %v2126_v3, 0.0  ;;  %v2125_v5 = vadd.f32 %v2117_v2, %v1924_v39 }
 0xf4c   :  { %2133 = vadd.xlane.f32.xlu0 %v2132_v4 }
 0xf4d   :  { %v2129_v6 = vsel %vm123_vm0, %v2125_v5, 0.0 }
 0xf4e   :  { %2130 = vadd.xlane.f32.xlu1 %v2129_v6 }
 0xfd5   :  { %v2134_v7 = vpop.xlane.xlu0 %2133 }
 0xfd6   :  { %v2136_v8 = vmul.f32 0.03125, %v2134_v7 }
 0xfd7   :  { %v2131_v9 = vpop.xlane.xlu1 %2130 }
 0xfd8   :  { %v2138_v13 = vsub.f32 %v2126_v3, %v2136_v8  ;;  %v2135_v14 = vmul.f32 0.03125, %v2131_v9 }
 0xfda   :  { %v2137_v15 = vsub.f32 %v2125_v5, %v2135_v14  ;;  %v2140_v18 = vmul.f32 %v2138_v13, %v2138_v13 }
 0xfdc   :  { %v2144_v19 = vsel %vm123_vm0, %v2140_v18, 0.0  ;;  %v2139_v20 = vmul.f32 %v2137_v15, %v2137_v15 }
 0xfdd   :  { %2145 = vadd.xlane.f32.xlu0 %v2144_v19 }
 0xfde   :  { %v2141_v11 = vsel %vm123_vm0, %v2139_v20, 0.0 }
 0xfdf   :  { %2142 = vadd.xlane.f32.xlu1 %v2141_v11 }
0x1066   :  { %v2146_v25 = vpop.xlane.xlu0 %2145 }
0x1067   :  { %v2148_v26 = vmul.f32 0.03125, %v2146_v25 }
0x1068   :  { %v2143_v27 = vpop.xlane.xlu1 %2142 }
0x1069   :  { %v2150_v28 = vadd.f32 1e-05, %v2148_v26  ;;  %v2147_v29 = vmul.f32 0.03125, %v2143_v27 }
0x106b   :  { %4965 = vrsqrt.f32 %v2150_v28  ;;  %v2149_v30 = vadd.f32 1e-05, %v2147_v29 }
0x106d   :  { %4967 = vrsqrt.f32 %v2149_v30 }
0x1078   :  { %v4966_v31 = vpop.eup %4965 }
0x1079   :  { %v2154_v33 = vmul.f32 %v4966_v31, %v2138_v13 }
0x107a   :  { %v4968_v34 = vpop.eup %4967 }
0x107b   :  { %v2153_v35 = vmul.f32 %v4968_v34, %v2137_v15  ;;  %v2162_v36 = vmul.f32 %v4396_v32, %v2154_v33 }
0x107d   :  { %v2161_v38 = vmul.f32 %v4396_v32, %v2153_v35  ;;  %v5523_v42 = vadd.f32 %v4397_v37, %v2162_v36 }
0x107f   :  { %v5521_v39 = vadd.f32 %v4397_v37, %v2161_v38 }
0x1081   :  { %4762 = vmatprep.mubr.msk.f32.mxu0 %vm123_vm0, %v5521_v39 }
0x1082   :  { %4763 = vmatmul.mubr.msk.f32.vlgmr.msra.gmra.mxu0 %vm123_vm0, %v5523_v42 }
0x1083   :  { %4767 = vmatprep.mubr.msk.f32.mxu0 %vm5105_vm1, %v5104_v12 }
0x1142   :  { %v4764_v44 = vpop.f32.mrf.mxu0 }
0x1143   :  { %v5534_v45 = vadd.f32 %v4764_v44, %v4407_v43 }
0x1144   :  { %v2261_v40 = vpop.f32.mrf.mxu0 }
0x1145   :  { %v5536_v46 = vadd.f32 %v4407_v43, %v2261_v40  ;;  %2348 = vrot.lane.b32.xlu0 %v5534_v45, %s5106_s19 }
0x1147   :  { %2271 = vrot.lane.b32.xlu1 %v5536_v46, %s5106_s19 }
0x11b7   :  { %v2349_v41 = vpop.permute.xlu0 %2348 }
0x11b8   :  { %4771 = vmatpush3.xpose.msk.msra.mxu1 %vm208_vm2, %v2349_v41 }
0x11b9   :  { %v2272_v47 = vpop.permute.xlu1 %2271  ;;  %4780 = vmatprep.subr.mxu1 %v5104_v12 }
0x11ba   :  { %4766 = vmatpush3.xpose.msk.msra.mxu0 %vm208_vm2, %v2272_v47 }
0x11bb   :  { %4773 = vmatmul.mubr.msk.f32.vlgmr.msra.gmra.mxu1 %vm208_vm2, %v5534_v45  ;;  %4775 = vmatprep.subr.mxu0 %v5104_v12 }
0x11bc   :  { %4782 = vmatprep.mubr.msk.f32.mxu1 %vm5105_vm1, %v5104_v12 }
0x11bd   :  { %4768 = vmatmul.mubr.msk.f32.vlgmr.msra.gmra.mxu0 %vm208_vm2, %v5536_v46 }
0x11be   :  { %4777 = vmatprep.mubr.msk.f32.mxu0 %vm5105_vm1, %v5104_v12 }
0x127b   :  { %v2420_v48 = vpop.f32.mrf.mxu1 }
0x127c   :  { %v2425_v49 = vmul.f32 0.35355338, %v2420_v48 }
0x127d   :  { %v2343_v50 = vpop.f32.mrf.mxu0  ;;  %v4774_v51 = vpop.f32.mrf.mxu1 }
0x127e   :  { %v2424_v52 = vmul.f32 0.35355338, %v2343_v50  ;;  %v2427_v16 = vsel %vm5270_vm3, %v2425_v49, -1e+30  ;;  %v4402_v49 = vld [vmem:[%s5800_s4 + $0x20] sm:$0xff] }
0x127f   :  { %v4769_v53 = vpop.f32.mrf.mxu0  ;;  %v2431_v54 = vsel %vm208_vm2, %v2427_v16, -inf }
0x1280   :  { %2432 = vmax.xlane.f32.xlu0 %v2431_v54  ;;  %v2426_v55 = vsel %vm5270_vm3, %v2424_v52, -1e+30 }
0x1281   :  { %v2428_v56 = vsel %vm208_vm2, %v2426_v55, -inf }
0x1282   :  { %2429 = vmax.xlane.f32.xlu1 %v2428_v56 }
0x1293   :  { %2450 = vrot.lane.b32.xlu1 %v5536_v46, %s5107_s20 }
0x1296   :  { %2526 = vrot.lane.b32.xlu0 %v5534_v45, %s5107_s20 }
0x1297   :  { %2604 = vrot.lane.b32.xlu1 %v5536_v46, %s5108_s21 }
0x129b   :  { %2682 = vrot.lane.b32.xlu1 %v5534_v45, %s5108_s21 }
0x1309   :  { %v2433_v57 = vpop.xlane.xlu0 %2432 }
0x130a   :  { %v2435_v58 = vsub.f32 %v2427_v16, %v2433_v57  ;;  %v4403_v57 = vld [vmem:[%s5800_s4 + $0x28] sm:$0xff] }
0x130b   :  { %v2430_v59 = vpop.xlane.xlu1 %2429 }
0x130c   :  { %v2438_v17 = vmul.f32 1.442695, %v2435_v58  ;;  %v2434_v60 = vsub.f32 %v2426_v55, %v2430_v59 }
0x130d   :  { %v2527_v61 = vpop.permute.xlu0 %2526 }
0x130e   :  { %4969 = vpow2.f32 %v2438_v17  ;;  %v2436_v62 = vmul.f32 1.442695, %v2434_v60  ;;  %4781 = vmatpush3.msra.mxu1 %v2527_v61 }
0x130f   :  { %v2451_v63 = vpop.permute.xlu1 %2450  ;;  %4790 = vmatprep.subr.mxu1 %v5104_v12 }
0x1310   :  { %4971 = vpow2.f32 %v2436_v62  ;;  %4776 = vmatpush3.msra.mxu0 %v2451_v63 }
0x1311   :  { %4785 = vmatprep.subr.mxu0 %v5104_v12 }
0x1313   :  { %v2605_v4 = vpop.permute.xlu1 %2604 }
0x1317   :  { %v2683_v5 = vpop.permute.xlu1 %2682 }
0x131b   :  { %v4970_v0 = vpop.eup %4969 }
0x131c   :  { %v2443_v1 = vsel %vm208_vm2, %v4970_v0, 0.0 }
0x131d   :  { %v4972_v2 = vpop.eup %4971  ;;  %2444 = vadd.xlane.f32.xlu0 %v2443_v1 }
0x131e   :  { %v2440_v3 = vsel %vm208_vm2, %v4972_v2, 0.0 }
0x131f   :  { %2441 = vadd.xlane.f32.xlu1 %v2440_v3 }
0x1330   :  { %2680 = vrot.lane.b32.xlu1 %v5534_v45, %s5109_s1 }
0x1333   :  { %2602 = vrot.lane.b32.xlu0 %v5536_v46, %s5109_s1  ;;  %s5823_s1 = smov 104  }
0x13a6   :  { %v2445_v6 = vpop.xlane.xlu0 %2444 }
0x13a7   :  { %4973 = vrcp.f32 %v2445_v6 }
0x13a8   :  { %v2442_v7 = vpop.xlane.xlu1 %2441 }
0x13a9   :  { %4975 = vrcp.f32 %v2442_v7 }
0x13aa   :  { %v2603_v18 = vpop.permute.xlu0 %2602 }
0x13ac   :  { %v2681_v15 = vpop.permute.xlu1 %2680 }
0x13b4   :  { %v4974_v8 = vpop.eup %4973 }
0x13b5   :  { %v2449_v9 = vmul.f32 %v4974_v8, %v4970_v0 }
0x13b6   :  { %v4976_v13 = vpop.eup %4975 }
0x13b7   :  { %4783 = vmatmul.mubr.msk.f32.vlgmr.msra.gmra.mxu1 %vm208_vm2, %v2449_v9  ;;  %v2447_v14 = vmul.f32 %v4976_v13, %v4972_v2 }
0x13b8   :  { %4791 = vmatpush3.xpose.msk.msra.mxu1 %vm208_vm2, %v2683_v5  ;;  %4792 = vmatprep.mubr.msk.f32.mxu1 %vm5105_vm1, %v5104_v12 }
0x13b9   :  { %4778 = vmatmul.mubr.msk.f32.vlgmr.msra.gmra.mxu0 %vm208_vm2, %v2447_v14  ;;  %4800 = vmatprep.subr.mxu1 %v5104_v12 }
0x13ba   :  { %4786 = vmatpush3.xpose.msk.msra.mxu0 %vm208_vm2, %v2605_v4  ;;  %4787 = vmatprep.mubr.msk.f32.mxu0 %vm5105_vm1, %v5104_v12 }
0x13bb   :  { %4793 = vmatmul.mubr.msk.f32.vlgmr.msra.gmra.mxu1 %vm208_vm2, %v2681_v15  ;;  %4795 = vmatprep.subr.mxu0 %v5104_v12 }
0x13bc   :  { %4802 = vmatprep.mubr.msk.f32.mxu1 %vm5105_vm1, %v5104_v12 }
0x13bd   :  { %4788 = vmatmul.mubr.msk.f32.vlgmr.msra.gmra.mxu0 %vm208_vm2, %v2603_v18 }
0x13be   :  { %4797 = vmatprep.mubr.msk.f32.mxu0 %vm5105_vm1, %v5104_v12 }
0x1477   :  { %v2598_v19 = vpop.f32.mrf.mxu1 }
0x1479   :  { %v2522_v20 = vpop.f32.mrf.mxu0  ;;  %v4784_v11 = vpop.f32.mrf.mxu1 }
0x147b   :  { %v4779_v10 = vpop.f32.mrf.mxu0  ;;  %v2754_v21 = vpop.f32.mrf.mxu1 }
0x147c   :  { %v2759_v22 = vmul.f32 0.35355338, %v2754_v21 }
0x147d   :  { %v2676_v23 = vpop.f32.mrf.mxu0  ;;  %v4794_v25 = vpop.f32.mrf.mxu1 }
0x147e   :  { %v2758_v26 = vmul.f32 0.35355338, %v2676_v23  ;;  %v2761_v27 = vsel %vm5270_vm3, %v2759_v22, -1e+30 }
0x147f   :  { %v4789_v28 = vpop.f32.mrf.mxu0  ;;  %v2765_v29 = vsel %vm208_vm2, %v2761_v27, -inf }
0x1480   :  { %2766 = vmax.xlane.f32.xlu1 %v2765_v29  ;;  %v2760_v30 = vsel %vm5270_vm3, %v2758_v26, -1e+30 }
0x1481   :  { %v2762_v31 = vsel %vm208_vm2, %v2760_v30, -inf }
0x1482   :  { %2763 = vmax.xlane.f32.xlu0 %v2762_v31 }
0x1491   :  { %2784 = vrot.lane.b32.xlu1 %v5536_v46, %s5110_s22 }
0x1495   :  { %3100 = vrot.lane.b32.xlu1 %v5536_v46, %s5112_s24 }
0x1499   :  { %3178 = vrot.lane.b32.xlu1 %v5534_v45, %s5112_s24  ;;  %s5824_s24 = smov 40  }
0x149d   :  { %3176 = vrot.lane.b32.xlu1 %v5534_v45, %s5111_s23 }
0x1509   :  { %v2767_v32 = vpop.xlane.xlu1 %2766 }
0x150a   :  { %v2769_v33 = vsub.f32 %v2761_v27, %v2767_v32 }
0x150b   :  { %v2764_v34 = vpop.xlane.xlu0 %2763 }
0x150c   :  { %v2772_v35 = vmul.f32 1.442695, %v2769_v33  ;;  %v2768_v36 = vsub.f32 %v2760_v30, %v2764_v34 }
0x150d   :  { %v2785_v37 = vpop.permute.xlu1 %2784 }
0x150e   :  { %4977 = vpow2.f32 %v2772_v35  ;;  %v2770_v38 = vmul.f32 1.442695, %v2768_v36  ;;  %4796 = vmatpush3.msra.mxu0 %v2785_v37  ;;  %v4404_v36 = vld [vmem:[%s5800_s4 + $0x30] sm:$0xff] }
0x150f   :  { %4805 = vmatprep.subr.mxu0 %v4403_v57 }
0x1510   :  { %4979 = vpow2.f32 %v2770_v38 }
0x1511   :  { %v3101_v51 = vpop.permute.xlu1 %3100 }
0x1515   :  { %v3179_v54 = vpop.permute.xlu1 %3178 }
0x1519   :  { %v3177_v56 = vpop.permute.xlu1 %3176 }
0x151b   :  { %v4978_v43 = vpop.eup %4977 }
0x151c   :  { %v2777_v44 = vsel %vm208_vm2, %v4978_v43, 0.0 }
0x151d   :  { %v4980_v40 = vpop.eup %4979  ;;  %2778 = vadd.xlane.f32.xlu0 %v2777_v44 }
0x151e   :  { %v2774_v41 = vsel %vm208_vm2, %v4980_v40, 0.0 }
0x1521   :  { %2775 = vadd.xlane.f32.xlu0 %v2774_v41 }
0x1537   :  { %2860 = vrot.lane.b32.xlu0 %v5534_v45, %s5110_s22 }
0x153b   :  { %3098 = vrot.lane.b32.xlu0 %v5536_v46, %s5111_s23 }
0x15a6   :  { %v2779_v47 = vpop.xlane.xlu0 %2778 }
0x15a7   :  { %4981 = vrcp.f32 %v2779_v47 }
0x15aa   :  { %v2776_v48 = vpop.xlane.xlu0 %2775 }
0x15ab   :  { %4983 = vrcp.f32 %v2776_v48 }
0x15ae   :  { %v2861_v50 = vpop.permute.xlu0 %2860 }
0x15af   :  { %4801 = vmatpush3.msra.mxu1 %v2861_v50 }
0x15b0   :  { %4810 = vmatprep.subr.mxu1 %v4402_v49 }
0x15b2   :  { %v3099_v0 = vpop.permute.xlu0 %3098 }
0x15b4   :  { %v4982_v52 = vpop.eup %4981 }
0x15b5   :  { %v2783_v16 = vmul.f32 %v4982_v52, %v4978_v43 }
0x15b7   :  { %4803 = vmatmul.mubr.msk.f32.vlgmr.msra.gmra.mxu1 %vm208_vm2, %v2783_v16 }
0x15b8   :  { %v4984_v53 = vpop.eup %4983  ;;  %4812 = vmatprep.mubr.msk.f32.mxu1 %vm208_vm2, %v2522_v20  ;;  %4811 = vmatpush3.msra.mxu1 %v4402_v49 }
0x15b9   :  { %4820 = vmatprep.subr.mxu1 %v5104_v12  ;;  %v2781_v55 = vmul.f32 %v4984_v53, %v4980_v40 }
0x15bb   :  { %4798 = vmatmul.mubr.msk.f32.vlgmr.msra.gmra.mxu0 %vm208_vm2, %v2781_v55  ;;  %4813 = vmatmul.mubr.msk.f32.vlgmr.msra.gmra.mxu1 %vm208_vm2, %v2598_v19 }
0x15bc   :  { %4821 = vmatpush3.xpose.msk.msra.mxu1 %vm208_vm2, %v3179_v54  ;;  %4822 = vmatprep.mubr.msk.f32.mxu1 %vm5105_vm1, %v5104_v12 }
0x15bd   :  { %4830 = vmatprep.subr.mxu1 %v5104_v12  ;;  %4806 = vmatpush3.msra.mxu0 %v4403_v57 }
0x15be   :  { %4815 = vmatprep.subr.mxu0 %v5104_v12 }
0x15bf   :  { %4823 = vmatmul.mubr.msk.f32.vlgmr.msra.gmra.mxu1 %vm208_vm2, %v3177_v56 }
0x15c0   :  { %4832 = vmatprep.mubr.msk.f32.mxu1 %vm5105_vm1, %v5104_v12 }
0x1677   :  { %v2932_v58 = vpop.f32.mrf.mxu1 }
0x1679   :  { %v4804_v59 = vpop.f32.mrf.mxu1 }
0x167b   :  { %v2856_v17 = vpop.f32.mrf.mxu0  ;;  %v5631_v60 = vpop.f32.mrf.mxu1 }
0x167c   :  { %4807 = vmatprep.mubr.msk.f32.mxu0 %vm208_vm2, %v2856_v17 }
0x167d   :  { %v4799_v61 = vpop.f32.mrf.mxu0  ;;  %4808 = vmatmul.mubr.msk.f32.vlgmr.msra.gmra.mxu0 %vm208_vm2, %v2932_v58  ;;  %v5635_v62 = vpop.f32.mrf.mxu1 }
0x167e   :  { %4816 = vmatpush3.xpose.msk.msra.mxu0 %vm208_vm2, %v3101_v51  ;;  %4817 = vmatprep.mubr.msk.f32.mxu0 %vm5105_vm1, %v5104_v12 }
0x167f   :  { %v3250_v63 = vpop.f32.mrf.mxu1  ;;  %4825 = vmatprep.subr.mxu0 %v5104_v12 }
0x1680   :  { %v3255_v1 = vmul.f32 0.35355338, %v3250_v63 }
0x1681   :  { %4818 = vmatmul.mubr.msk.f32.vlgmr.msra.gmra.mxu0 %vm208_vm2, %v3099_v0  ;;  %v4824_v2 = vpop.f32.mrf.mxu1 }
0x1682   :  { %v3257_v3 = vsel %vm5270_vm3, %v3255_v1, -1e+30  ;;  %4827 = vmatprep.mubr.msk.f32.mxu0 %vm5105_vm1, %v5104_v12 }
0x1683   :  { %v3261_v4 = vsel %vm208_vm2, %v3257_v3, -inf }
0x1684   :  { %3262 = vmax.xlane.f32.xlu1 %v3261_v4 }
0x1695   :  { %3280 = vrot.lane.b32.xlu1 %v5536_v46, %s5113_s14 }
0x1699   :  { %3517 = vrot.lane.b32.xlu1 %v5536_v46, %s5114_s0 }
0x169d   :  { %3595 = vrot.lane.b32.xlu1 %v5534_v45, %s5114_s0 }
0x16a1   :  { %3593 = vrot.lane.b32.xlu1 %v5534_v45, %s5823_s1 }
0x170d   :  { %v3263_v5 = vpop.xlane.xlu1 %3262 }
0x170e   :  { %v3265_v7 = vsub.f32 %v3257_v3, %v3263_v5 }
0x1710   :  { %v3268_v8 = vmul.f32 1.442695, %v3265_v7 }
0x1711   :  { %v3281_v6 = vpop.permute.xlu1 %3280 }
0x1712   :  { %4826 = vmatpush3.msra.mxu0 %v3281_v6  ;;  %4985 = vpow2.f32 %v3268_v8 }
0x1713   :  { %4835 = vmatprep.subr.mxu0 %v4404_v36 }
0x1715   :  { %v3518_v32 = vpop.permute.xlu1 %3517 }
0x1719   :  { %v3596_v48 = vpop.permute.xlu1 %3595 }
0x171d   :  { %v3594_v51 = vpop.permute.xlu1 %3593 }
0x171f   :  { %v4986_v11 = vpop.eup %4985 }
0x1720   :  { %v3273_v10 = vsel %vm208_vm2, %v4986_v11, 0.0 }
0x173d   :  { %v5655_v9 = vpop.f32.mrf.mxu0 }
0x173e   :  { %v3095_v56 = vadd.f32 %v5631_v60, %v5655_v9 }
0x173f   :  { %v5657_v13 = vpop.f32.mrf.mxu0 }
0x1740   :  { %v3090_v58 = vadd.f32 %v5635_v62, %v5657_v13 }
0x1741   :  { %v3172_v14 = vpop.f32.mrf.mxu0 }
0x1742   :  { %v3254_v15 = vmul.f32 0.35355338, %v3172_v14 }
0x1743   :  { %v4819_v18 = vpop.f32.mrf.mxu0 }
0x1744   :  { %v3256_v19 = vsel %vm5270_vm3, %v3254_v15, -1e+30 }
0x1745   :  { %v3258_v20 = vsel %vm208_vm2, %v3256_v19, -inf }
0x1746   :  { %3259 = vmax.xlane.f32.xlu0 %v3258_v20 }
0x174a   :  { %3274 = vadd.xlane.f32.xlu0 %v3273_v10  ;;  %v4443_v10 = vld [vmem:[%s5801_s5 + $0x1] ss:$0 sm:$0xff] }
0x17cf   :  { %v3260_v21 = vpop.xlane.xlu0 %3259 }
0x17d0   :  { %v3264_v22 = vsub.f32 %v3256_v19, %v3260_v21 }
0x17d2   :  { %v3266_v23 = vmul.f32 1.442695, %v3264_v22 }
0x17d3   :  { %v3275_v27 = vpop.xlane.xlu0 %3274 }
0x17d4   :  { %4987 = vpow2.f32 %v3266_v23 }
0x17d5   :  { %4989 = vrcp.f32 %v3275_v27 }
0x17e1   :  { %v4988_v25 = vpop.eup %4987 }
0x17e2   :  { %v3270_v26 = vsel %vm208_vm2, %v4988_v25, 0.0  ;;  %v4990_v29 = vpop.eup %4989 }
0x17e3   :  { %3271 = vadd.xlane.f32.xlu0 %v3270_v26  ;;  %v3279_v31 = vmul.f32 %v4990_v29, %v4986_v11 }
0x17f9   :  { %3356 = vrot.lane.b32.xlu0 %v5534_v45, %s5113_s14 }
0x17fd   :  { %3515 = vrot.lane.b32.xlu0 %v5536_v46, %s5823_s1 }
0x186c   :  { %v3272_v28 = vpop.xlane.xlu0 %3271 }
0x186d   :  { %4991 = vrcp.f32 %v3272_v28 }
0x1870   :  { %v3357_v30 = vpop.permute.xlu0 %3356 }
0x1871   :  { %4831 = vmatpush3.msra.mxu1 %v3357_v30 }
0x1872   :  { %4833 = vmatmul.mubr.msk.f32.vlgmr.msra.gmra.mxu1 %vm208_vm2, %v3279_v31  ;;  %4840 = vmatprep.subr.mxu1 %v5104_v12 }
0x1873   :  { %4841 = vmatpush3.xpose.msk.msra.mxu1 %vm208_vm2, %v3518_v32  ;;  %4842 = vmatprep.mubr.msk.f32.mxu1 %vm5105_vm1, %v5104_v12 }
0x1874   :  { %v3516_v33 = vpop.permute.xlu0 %3515  ;;  %4850 = vmatprep.subr.mxu1 %v5104_v12 }
0x1876   :  { %4843 = vmatmul.mubr.msk.f32.vlgmr.msra.gmra.mxu1 %vm208_vm2, %v3516_v33 }
0x1877   :  { %4852 = vmatprep.mubr.msk.f32.mxu1 %vm5105_vm1, %v5104_v12 }
0x187a   :  { %v4992_v34 = vpop.eup %4991 }
0x187b   :  { %v3277_v35 = vmul.f32 %v4992_v34, %v4988_v25 }
0x187d   :  { %4828 = vmatmul.mubr.msk.f32.vlgmr.msra.gmra.mxu0 %vm208_vm2, %v3277_v35 }
0x187e   :  { %4836 = vmatpush3.msra.mxu0 %v4404_v36 }
0x187f   :  { %4845 = vmatprep.subr.mxu0 %v5104_v12 }
0x1932   :  { %v3428_v37 = vpop.f32.mrf.mxu1 }
0x1934   :  { %v4834_v38 = vpop.f32.mrf.mxu1 }
0x1936   :  { %v3589_v43 = vpop.f32.mrf.mxu1 }
0x1937   :  { %v3671_v44 = vmul.f32 0.35355338, %v3589_v43 }
0x1938   :  { %v4844_v40 = vpop.f32.mrf.mxu1 }
0x1939   :  { %v3673_v41 = vsel %vm5270_vm3, %v3671_v44, -1e+30  ;;  %v4450_v44 = vld [vmem:[%s5802_s6 + $0x30] sm:$0xff]  ;;  %v4449_v40 = vld [vmem:[%s5802_s6 + $0x28] sm:$0xff] }
0x193a   :  { %v3675_v47 = vsel %vm208_vm2, %v3673_v41, -inf }
0x193b   :  { %3676 = vmax.xlane.f32.xlu0 %v3675_v47 }
0x193d   :  { %v3352_v49 = vpop.f32.mrf.mxu0 }
0x193e   :  { %4837 = vmatprep.mubr.msk.f32.mxu0 %vm208_vm2, %v3352_v49 }
0x193f   :  { %v4829_v50 = vpop.f32.mrf.mxu0  ;;  %4838 = vmatmul.mubr.msk.f32.vlgmr.msra.gmra.mxu0 %vm208_vm2, %v3428_v37 }
0x1940   :  { %4846 = vmatpush3.xpose.msk.msra.mxu0 %vm208_vm2, %v3596_v48  ;;  %4847 = vmatprep.mubr.msk.f32.mxu0 %vm5105_vm1, %v5104_v12 }
0x1941   :  { %4855 = vmatprep.subr.mxu0 %v5104_v12 }
0x1943   :  { %4848 = vmatmul.mubr.msk.f32.vlgmr.msra.gmra.mxu0 %vm208_vm2, %v3594_v51 }
0x1944   :  { %4857 = vmatprep.mubr.msk.f32.mxu0 %vm5105_vm1, %v5104_v12 }
0x19c4   :  { %v3677_v52 = vpop.xlane.xlu0 %3676 }
0x19c5   :  { %v3681_v16 = vsub.f32 %v3673_v41, %v3677_v52  ;;  %v4448_v41 = vld [vmem:[%s5802_s6 + $0x20] sm:$0xff] }
0x19c7   :  { %v3683_v53 = vmul.f32 1.442695, %v3681_v16 }
0x19c9   :  { %4993 = vpow2.f32 %v3683_v53  ;;  %v4446_v53 = vld [vmem:[%s5806_s10 + $0x1] ss:$0 sm:$0xff] }
0x19d6   :  { %v4994_v54 = vpop.eup %4993 }
0x19d7   :  { %v3687_v55 = vsel %vm208_vm2, %v4994_v54, 0.0 }
0x19d8   :  { %3688 = vadd.xlane.f32.xlu0 %v3687_v55 }
0x19ff   :  { %v4839_v57 = vpop.f32.mrf.mxu0 }
0x1a00   :  { %v3514_v59 = vadd.f32 %v4839_v57, %v3095_v56 }
0x1a01   :  { %v3504_v17 = vpop.f32.mrf.mxu0 }
0x1a02   :  { %v3513_v61 = vadd.f32 %v3504_v17, %v3090_v58  ;;  %v4447_v58 = vld [vmem:[%s5807_s11 + $0x1] ss:$0 sm:$0xff] }
0x1a03   :  { %v3667_v63 = vpop.f32.mrf.mxu0 }
0x1a04   :  { %v3672_v12 = vmul.f32 0.35355338, %v3667_v63  ;;  %v4463_v63 = vld [vmem:[%s5804_s8 + $0x78] sm:$0xff] }
0x1a05   :  { %v4849_v0 = vpop.f32.mrf.mxu0 }
0x1a06   :  { %v3674_v1 = vsel %vm5270_vm3, %v3672_v12, -1e+30  ;;  %v4462_v12 = vld [vmem:[%s5804_s8 + $0x70] sm:$0xff]  ;;  %v4461_v0 = vld [vmem:[%s5804_s8 + $0x68] sm:$0xff] }
0x1a07   :  { %v3678_v2 = vsel %vm208_vm2, %v3674_v1, -inf }
0x1a08   :  { %3679 = vmax.xlane.f32.xlu1 %v3678_v2  ;;  %v4459_v2 = vld [vmem:[%s5804_s8 + $0x58] sm:$0xff] }
0x1a19   :  { %3697 = vrot.lane.b32.xlu1 %v5536_v46, %s5824_s24  ;;  %v4405_v46 = vld [vmem:[%s5800_s4 + $0x38] sm:$0xff] }
0x1a61   :  { %v3689_v60 = vpop.xlane.xlu0 %3688 }
0x1a62   :  { %4995 = vrcp.f32 %v3689_v60  ;;  %v4458_v60 = vld [vmem:[%s5804_s8 + $0x50] sm:$0xff] }
0x1a6f   :  { %v4996_v4 = vpop.eup %4995 }
0x1a70   :  { %v3694_v7 = vmul.f32 %v4996_v4, %v4994_v54  ;;  %v4456_v4 = vld [vmem:[%s5804_s8 + $0x40] sm:$0xff] }
0x1a91   :  { %v3680_v3 = vpop.xlane.xlu1 %3679 }
0x1a92   :  { %v3682_v62 = vsub.f32 %v3674_v1, %v3680_v3  ;;  %v4460_v1 = vld [vmem:[%s5804_s8 + $0x60] sm:$0xff]  ;;  %v4457_v3 = vld [vmem:[%s5804_s8 + $0x48] sm:$0xff] }
0x1a94   :  { %v3685_v5 = vmul.f32 1.442695, %v3682_v62  ;;  %v4453_v62 = vld [vmem:[%s5803_s7 + $0x1] ss:$0 sm:$0xff] }
0x1a95   :  { %v3698_v6 = vpop.permute.xlu1 %3697 }
0x1a96   :  { %4997 = vpow2.f32 %v3685_v5  ;;  %4851 = vmatpush3.msra.mxu1 %v3698_v6 }
0x1a97   :  { %4853 = vmatmul.mubr.msk.f32.vlgmr.msra.gmra.mxu1 %vm208_vm2, %v3694_v7  ;;  %4860 = vmatprep.subr.mxu1 %v4405_v46 }
0x1a98   :  { %4861 = vmatpush3.msra.mxu1 %v4405_v46 }
0x1a99   :  { %4876 = vmatprep.subr.mxu1 %v4463_v63 }
0x1aa3   :  { %v4998_v24 = vpop.eup %4997 }
0x1aa4   :  { %v3690_v8 = vsel %vm208_vm2, %v4998_v24, 0.0 }
0x1aa5   :  { %3691 = vadd.xlane.f32.xlu0 %v3690_v8 }
0x1abb   :  { %3773 = vrot.lane.b32.xlu0 %v5534_v45, %s5824_s24 }
0x1b2e   :  { %v3692_v9 = vpop.xlane.xlu0 %3691 }
0x1b2f   :  { %4999 = vrcp.f32 %v3692_v9 }
0x1b32   :  { %v3774_v13 = vpop.permute.xlu0 %3773 }
0x1b33   :  { %4856 = vmatpush3.msra.mxu0 %v3774_v13 }
0x1b3c   :  { %v5000_v14 = vpop.eup %4999 }
0x1b3d   :  { %v3696_v15 = vmul.f32 %v5000_v14, %v4998_v24 }
0x1b3f   :  { %4858 = vmatmul.mubr.msk.f32.vlgmr.msra.gmra.mxu0 %vm208_vm2, %v3696_v15 }
0x1b57   :  { %v3769_v18 = vpop.f32.mrf.mxu1 }
0x1b58   :  { %4862 = vmatprep.mubr.msk.f32.mxu1 %vm208_vm2, %v3769_v18 }
0x1b59   :  { %v4854_v19 = vpop.f32.mrf.mxu1 }
0x1bff   :  { %v3845_v20 = vpop.f32.mrf.mxu0 }
0x1c00   :  { %4863 = vmatmul.mubr.msk.f32.vlgmr.msra.gmra.mxu1 %vm208_vm2, %v3845_v20 }
0x1c01   :  { %v4859_v45 = vpop.f32.mrf.mxu0  ;;  %4877 = vmatpush3.msra.mxu1 %v4463_v63 }
0x1c02   :  { %4878 = vmatprep.subr.mxu1 %v4462_v12 }
0x1c03   :  { %4879 = vmatpush3.msra.mxu1 %v4462_v12 }
0x1c04   :  { %4880 = vmatprep.subr.mxu1 %v4461_v0 }
0x1c05   :  { %4881 = vmatpush3.msra.mxu1 %v4461_v0 }
0x1c06   :  { %4882 = vmatprep.subr.mxu1 %v4460_v1 }
0x1c07   :  { %4883 = vmatpush3.msra.mxu1 %v4460_v1 }
0x1c08   :  { %4884 = vmatprep.subr.mxu1 %v4459_v2 }
0x1c09   :  { %4885 = vmatpush3.msra.mxu1 %v4459_v2 }
0x1c0a   :  { %4886 = vmatprep.subr.mxu1 %v4458_v60 }
0x1c0b   :  { %4887 = vmatpush3.msra.mxu1 %v4458_v60 }
0x1c0c   :  { %4888 = vmatprep.subr.mxu1 %v4457_v3 }
0x1c0d   :  { %4889 = vmatpush3.msra.mxu1 %v4457_v3 }
0x1c0e   :  { %4890 = vmatprep.subr.mxu1 %v4456_v4 }
0x1c0f   :  { %4891 = vmatpush3.msra.mxu1 %v4456_v4 }
0x1cc0   :  { %v4864_v11 = vpop.f32.mrf.mxu1 }
0x1cc1   :  { %v3931_v21 = vadd.f32 %v4864_v11, %v3514_v59  ;;  %v4465_v11 = vld [vmem:[%s5805_s9 + $0x1] ss:$0 sm:$0xff] }
0x1cc2   :  { %v3921_v22 = vpop.f32.mrf.mxu1 }
0x1cc3   :  { %v3941_v23 = vadd.f32 %v4443_v10, %v3931_v21  ;;  %v3930_v25 = vadd.f32 %v3921_v22, %v3513_v61 }
0x1cc5   :  { %v3940_v26 = vadd.f32 %v4443_v10, %v3930_v25  ;;  %v3943_v27 = vadd.f32 %v3941_v23, %v5523_v42 }
0x1cc7   :  { %v3951_v28 = vsel %vm123_vm0, %v3943_v27, 0.0  ;;  %v3942_v29 = vadd.f32 %v3940_v26, %v5521_v39  ;;  %v4451_v39 = vld [vmem:[%s5802_s6 + $0x38] sm:$0xff] }
0x1cc8   :  { %3952 = vadd.xlane.f32.xlu0 %v3951_v28  ;;  %4865 = vmatprep.subr.mxu0 %v4451_v39 }
0x1cc9   :  { %v3948_v30 = vsel %vm123_vm0, %v3942_v29, 0.0  ;;  %4866 = vmatpush3.msra.mxu0 %v4451_v39  ;;  %v4241_v39 = vld [vmem:[#allocation7 + $0x8] sm:$0xff] }
0x1cca   :  { %3949 = vadd.xlane.f32.xlu1 %v3948_v30  ;;  %4867 = vmatprep.subr.mxu0 %v4450_v44 }
0x1ccb   :  { %4868 = vmatpush3.msra.mxu0 %v4450_v44  ;;  %v4240_v44 = vld [vmem:[#allocation7] sm:$0xff] }
0x1ccc   :  { %4869 = vmatprep.subr.mxu0 %v4449_v40 }
0x1ccd   :  { %4870 = vmatpush3.msra.mxu0 %v4449_v40 }
0x1cce   :  { %4871 = vmatprep.subr.mxu0 %v4448_v41 }
0x1ccf   :  { %4872 = vmatpush3.msra.mxu0 %v4448_v41 }
0x1d51   :  { %v3953_v31 = vpop.xlane.xlu0 %3952 }
0x1d52   :  { %v3955_v32 = vmul.f32 0.03125, %v3953_v31 }
0x1d53   :  { %v3950_v33 = vpop.xlane.xlu1 %3949 }
0x1d54   :  { %v3957_v34 = vsub.f32 %v3943_v27, %v3955_v32  ;;  %v3954_v35 = vmul.f32 0.03125, %v3950_v33 }
0x1d56   :  { %v3956_v36 = vsub.f32 %v3942_v29, %v3954_v35  ;;  %v3959_v37 = vmul.f32 %v3957_v34, %v3957_v34 }
0x1d58   :  { %v3963_v38 = vsel %vm123_vm0, %v3959_v37, 0.0  ;;  %v3958_v43 = vmul.f32 %v3956_v36, %v3956_v36 }
0x1d59   :  { %3964 = vadd.xlane.f32.xlu0 %v3963_v38 }
0x1d5a   :  { %v3960_v42 = vsel %vm123_vm0, %v3958_v43, 0.0  ;;  %v4243_v43 = vld [vmem:[#allocation7 + $0x18] sm:$0xff] }
0x1d5b   :  { %3961 = vadd.xlane.f32.xlu1 %v3960_v42  ;;  %v4242_v42 = vld [vmem:[#allocation7 + $0x10] sm:$0xff]  ;;  %4895 = vmatprep.subr.mxu0 %v4243_v43 }
0x1de2   :  { %v3965_v47 = vpop.xlane.xlu0 %3964 }
0x1de3   :  { %v3967_v48 = vmul.f32 0.03125, %v3965_v47 }
0x1de4   :  { %v3962_v49 = vpop.xlane.xlu1 %3961 }
0x1de5   :  { %v3969_v50 = vadd.f32 1e-05, %v3967_v48  ;;  %v3966_v51 = vmul.f32 0.03125, %v3962_v49 }
0x1de7   :  { %5001 = vrsqrt.f32 %v3969_v50  ;;  %v3968_v52 = vadd.f32 1e-05, %v3966_v51 }
0x1de9   :  { %5003 = vrsqrt.f32 %v3968_v52  ;;  %v4470_v52 = vld [vmem:[%s5808_s12 + $0x1] ss:$0 sm:$0xff]  ;;  %s5117_s12 = smov [#allocation8]  }
0x1dea   :  { %s4339_s19 = sshll.u32 %s5117_s12, 4  ;;  %s4340_s19 = int_to_ptr.vmem [resolvable:$true] %s4339_s19 }
0x1deb   :  { %p5078_p2 = scmp.lt.s32.totalorder %s4340_s19, %s4340_s19 }
0x1df4   :  { %v5002_v16 = vpop.eup %5001 }
0x1df5   :  { %v3973_v54 = vmul.f32 %v5002_v16, %v3957_v34 }
0x1df6   :  { %v5004_v55 = vpop.eup %5003 }
0x1df7   :  { %v3972_v56 = vmul.f32 %v5004_v55, %v3956_v36  ;;  %v3981_v57 = vmul.f32 %v4446_v53, %v3973_v54 }
0x1df9   :  { %v3980_v59 = vmul.f32 %v4446_v53, %v3972_v56  ;;  %v3989_v61 = vadd.f32 %v4447_v58, %v3981_v57  ;;  %v4471_v56 = vld [vmem:[%s5809_s13 + $0x1] ss:$0 sm:$0xff]  ;;  %s5073_s13 = scalar_lea.vmem %s4340_s19, 256 }
0x1dfa   :  { %p5074_p1 = scmp.ne.s32.totalorder %s4340_s19, %s5073_s13  ;;  %p5079_p3 = scmp.lt.s32.totalorder %s5073_s13, %s5073_s13 }
0x1dfb   :  { %v3988_v17 = vadd.f32 %v4447_v58, %v3980_v59 }
0x1dfc   :  { %p5080_p4 = por %p5079_p3, %p5078_p2 }
0x1dfd   :  { %4873 = vmatprep.mubr.msk.f32.mxu0 %vm123_vm0, %v3988_v17 }
0x1dfe   :  { %4874 = vmatmul.mubr.msk.f32.vlgmr.msra.gmra.mxu0 %vm123_vm0, %v3989_v61  ;;  %p5081_p5 = pnand %p5080_p4, %p5074_p1 }
0x1dff   :  { %4896 = vmatpush3.msra.mxu0 %v4243_v43 }
0x1e00   :  { %4897 = vmatprep.subr.mxu0 %v4242_v42 }
0x1e01   :  { %4898 = vmatpush3.msra.mxu0 %v4242_v42 }
0x1e02   :  { %4899 = vmatprep.subr.mxu0 %v4241_v39 }
0x1e03   :  { %4900 = vmatpush3.msra.mxu0 %v4241_v39 }
0x1e04   :  { %4901 = vmatprep.subr.mxu0 %v4240_v44 }
0x1e05   :  { %4902 = vmatpush3.msra.mxu0 %v4240_v44 }
0x1ebe   :  { %v4875_v5 = vpop.f32.mrf.mxu0 }
0x1ebf   :  { %v4081_v6 = vadd.f32 %v4875_v5, %v4453_v62 }
0x1ec0   :  { %v4075_v7 = vpop.f32.mrf.mxu0 }
0x1ec1   :  { %v4087_v24 = vmul.f32 0.70710677, %v4081_v6  ;;  %v4076_v8 = vadd.f32 %v4453_v62, %v4075_v7  ;;  %v4085_v19 = vmul.f32 0.5, %v4081_v6 }
0x1ec3   :  { %5005 = verf.f32 %v4087_v24  ;;  %v4086_v46 = vmul.f32 0.70710677, %v4076_v8  ;;  %v4084_v15 = vmul.f32 0.5, %v4076_v8 }
0x1ec5   :  { %5007 = verf.f32 %v4086_v46 }
0x1ed0   :  { %v5006_v9 = vpop.eup %5005 }
0x1ed1   :  { %v4091_v14 = vadd.f32 1.0, %v5006_v9 }
0x1ed2   :  { %v5008_v13 = vpop.eup %5007 }
0x1ed3   :  { %v4090_v18 = vadd.f32 1.0, %v5008_v13  ;;  %v4093_v45 = vmul.f32 %v4091_v14, %v4085_v19 }
0x1ed5   :  { %v4092_v20 = vmul.f32 %v4090_v18, %v4084_v15 }
0x1ed7   :  { %4892 = vmatprep.mubr.msk.f32.mxu1 %vm2043_vm4, %v4092_v20 }
0x1ed8   :  { %4893 = vmatmul.mubr.msk.f32.vlgmr.msra.gmra.mxu1 %vm2043_vm4, %v4093_v45 }
0x1f98   :  { %v4894_v10 = vpop.f32.mrf.mxu1 }
0x1f99   :  { %v4189_v21 = vadd.f32 %v4894_v10, %v4465_v11 }
0x1f9a   :  { %v4183_v22 = vpop.f32.mrf.mxu1 }
0x1f9b   :  { %v4184_v23 = vadd.f32 %v4465_v11, %v4183_v22  ;;  %v4193_v25 = vadd.f32 %v4189_v21, %v3989_v61 }
0x1f9d   :  { %v4201_v26 = vsel %vm123_vm0, %v4193_v25, 0.0  ;;  %v4192_v27 = vadd.f32 %v4184_v23, %v3988_v17  ;;  %v4472_v17 = vld [vmem:[%s5811_s15] ss:$0 sm:$0xff] }
0x1f9e   :  { %4202 = vadd.xlane.f32.xlu0 %v4201_v26 }
0x1f9f   :  { %v4198_v28 = vsel %vm123_vm0, %v4192_v27, 0.0 }
0x1fa0   :  { %4199 = vadd.xlane.f32.xlu1 %v4198_v28 }
0x2027   :  { %v4203_v29 = vpop.xlane.xlu0 %4202 }
0x2028   :  { %v4205_v30 = vmul.f32 0.03125, %v4203_v29 }
0x2029   :  { %v4200_v31 = vpop.xlane.xlu1 %4199 }
0x202a   :  { %v4207_v32 = vsub.f32 %v4193_v25, %v4205_v30  ;;  %v4204_v33 = vmul.f32 0.03125, %v4200_v31 }
0x202c   :  { %v4206_v34 = vsub.f32 %v4192_v27, %v4204_v33  ;;  %v4209_v35 = vmul.f32 %v4207_v32, %v4207_v32 }
0x202e   :  { %v4213_v36 = vsel %vm123_vm0, %v4209_v35, 0.0  ;;  %v4208_v37 = vmul.f32 %v4206_v34, %v4206_v34 }
0x202f   :  { %4214 = vadd.xlane.f32.xlu0 %v4213_v36 }
0x2030   :  { %v4210_v38 = vsel %vm123_vm0, %v4208_v37, 0.0 }
0x2031   :  { %4211 = vadd.xlane.f32.xlu1 %v4210_v38 }
0x20b8   :  { %v4215_v40 = vpop.xlane.xlu0 %4214 }
0x20b9   :  { %v4217_v41 = vmul.f32 0.03125, %v4215_v40 }
0x20ba   :  { %v4212_v47 = vpop.xlane.xlu1 %4211 }
0x20bb   :  { %v4219_v48 = vadd.f32 1e-05, %v4217_v41  ;;  %v4216_v49 = vmul.f32 0.03125, %v4212_v47 }
0x20bd   :  { %5009 = vrsqrt.f32 %v4219_v48  ;;  %v4218_v50 = vadd.f32 1e-05, %v4216_v49 }
0x20bf   :  { %5011 = vrsqrt.f32 %v4218_v50 }
0x20ca   :  { %v5010_v51 = vpop.eup %5009 }
0x20cb   :  { %v4223_v16 = vmul.f32 %v5010_v51, %v4207_v32 }
0x20cc   :  { %v5012_v53 = vpop.eup %5011 }
0x20cd   :  { %v4222_v54 = vmul.f32 %v5012_v53, %v4206_v34  ;;  %v4231_v55 = vmul.f32 %v4470_v52, %v4223_v16 }
0x20cf   :  { %v4230_v57 = vmul.f32 %v4470_v52, %v4222_v54  ;;  %v4239_v59 = vadd.f32 %v4471_v56, %v4231_v55 }
0x20d1   :  { %v4238_v58 = vadd.f32 %v4471_v56, %v4230_v57 }
0x20d3   :  { %4903 = vmatprep.mubr.msk.f32.mxu0 %vm123_vm0, %v4238_v58 }
0x20d4   :  { %4904 = vmatmul.mubr.msk.f32.vlgmr.msra.gmra.mxu0 %vm123_vm0, %v4239_v59 }
0x2194   :  { %v4905_v61 = vpop.f32.mrf.mxu0 }
0x2195   :  { %v4329_v63 = vadd.f32 %v4905_v61, %v4472_v17 }
0x2196   :  { %v4323_v12 = vpop.f32.mrf.mxu0 }
0x2197   :  { %4333 = vst [vmem:[#allocation8 + $0x8] sm:$0xff] %v4329_v63  ;;  %v4324_v0 = vadd.f32 %v4472_v17, %v4323_v12 }
0x2199   :  { %4332 = vst [vmem:[#allocation8] sm:$0xff] %v4324_v0 }
0x219a   :  { %5084 = shalt.err (!%p5081_p5)
}
0x219b   :  { %s5825_s20 = smov 8   ;;  %s5826_s21 = smov 128  }
0x219c   :  { %4345 = dma.vmem_to_hbm [thread:$0]  %s4340_s19, 256, %s5812_s16, [#allocation4], %s5826_s21, %s5826_s21, %s5825_s20  }
0x219d   :  { %5097 = dma.done.wait [#allocation4], 256  }
0x219e   :  { %5098 = vsyncadd [#allocation4], 4294967040 }
0x219f   :  { %4349 = vsyncpa [#allocation3], 1 }
0x21a0   :  { %4350 = vsyncpa [#allocation6], 1 }
0x21a1   :  { %4351 = vsyncpa [#allocation4], 1 }

</bundles_post_ra>
